<compile_context>
chip_gen: v6e
topology: v6e:2x2x1
jax: 0.10.0
libtpu: 0.0.40
codegen_flags: <defaults>
</compile_context>

<pallas_src>
import functools

import jax
import jax.numpy as jnp
from jax import lax
from jax.experimental import pallas as pl
from jax.experimental.pallas import tpu as pltpu

F32 = jnp.float32
BF16 = jnp.bfloat16
LN_EPS = 1e-5
APPROX_RECIP = True        # pl.reciprocal(approx=...) in softmax; set False for parity tests
Q_TILE = 256               # in-kernel query tile for attention
FFN_TILE_TARGET = 1024     # token-tile target for the mem-bound FFN / LN kernels


def _vmem_limit_bytes():
    # Raise the scoped-VMEM cap (defaults: 16/32 MiB) to ~75% of physical capacity.
    cap = 64 * 1024 * 1024
    try:
        info = pltpu.get_tpu_info()
        cap = int(getattr(info, "vmem_capacity_bytes", cap))
    except Exception:
        pass
    return (cap * 3) // 4


_VMEM_LIMIT = _vmem_limit_bytes()


def _cparams(n_grid_dims):
    return pltpu.CompilerParams(
        dimension_semantics=("parallel",) * n_grid_dims,
        vmem_limit_bytes=_VMEM_LIMIT)


def _resident(arr):
    # Weights / biases: constant index_map -> fetched once, resident across grid steps.
    return pl.BlockSpec(arr.shape, lambda i: (0,) * arr.ndim)


# ----------------------------- kernels -----------------------------

def attn_fused_kernel(x_ref, pos_ref, wq_ref, bq_ref, wk_ref, bk_ref,
                      wv_ref, bv_ref, wo_ref, bo_ref, g_ref, b_ref,
                      o_ref, q_scr, k_scr, v_scr, *, nhead, scale, q_tile):
    # One batch per grid step.  Fused: QKV projection -> multi-head attention ->
    # out-projection -> residual -> LayerNorm1.  Heads use leading-batch dot_generals
    # (flash-style einsums); queries are tiled so only a (nhead, Tq, S) fp32 score
    # block is live at a time.
    S = x_ref.shape[1]
    x32 = x_ref[0]                                     # (S, D) fp32 residual stream
    h = (x32 + pos_ref[0]).astype(BF16)                # q/k source: x + pos
    xb = x32.astype(BF16)                              # v source: x

    # Head-split QKV projections into VMEM scratch (each iteration ends in a store,
    # so temporaries do not accumulate).  Weights are pre-split to (nhead, D, Dh).
    for hd in range(nhead):
        q = jnp.dot(h, wq_ref[hd], preferred_element_type=F32) + bq_ref[hd]
        k = jnp.dot(h, wk_ref[hd], preferred_element_type=F32) + bk_ref[hd]
        v = jnp.dot(xb, wv_ref[hd], preferred_element_type=F32) + bv_ref[hd]
        q_scr[hd] = (q * scale).astype(BF16)           # fold softmax scale into q
        k_scr[hd] = k.astype(BF16)
        v_scr[hd] = v.astype(BF16)

    k_h = k_scr[...]                                   # (nhead, S, Dh) bf16
    v_h = v_scr[...]

    n_tiles = -(-S // q_tile)                          # static python int
    for t in range(n_tiles):
        lo = t * q_tile
        hi = min(S, lo + q_tile)
        q_t = q_scr[:, lo:hi, :]                       # (nhead, Tq, Dh) bf16
        s = jnp.einsum('hqd,hkd->hqk', q_t, k_h,
                       preferred_element_type=F32)     # (nhead, Tq, S) fp32
        s = s - jnp.max(s, axis=-1, keepdims=True)
        p = jnp.exp(s)
        p = p * pl.reciprocal(jnp.sum(p, axis=-1, keepdims=True),
                              approx=APPROX_RECIP)
        o_h = jnp.einsum('hqk,hkd->hqd', p.astype(BF16), v_h,
                         preferred_element_type=F32)   # (nhead, Tq, Dh)
        # out-projection: sum_h o_h @ Wo_h, fused with residual + LayerNorm1
        part = jnp.einsum('hqd,hde->hqe', o_h.astype(BF16), wo_ref[...],
                          preferred_element_type=F32)  # (nhead, Tq, D)
        y = jnp.sum(part, axis=0) + bo_ref[...]        # (Tq, D) fp32
        res = x32[lo:hi, :] + y
        mu = jnp.mean(res, axis=-1, keepdims=True)
        var = jnp.mean((res - mu) ** 2, axis=-1, keepdims=True)
        out = (res - mu) * lax.rsqrt(var + LN_EPS) * g_ref[...] + b_ref[...]
        o_ref[0, lo:hi, :] = out.astype(o_ref.dtype)


def ffn_ln_kernel(x_ref, w1_ref, b1_ref, w2_ref, b2_ref, g_ref, b_ref,
                  gf_ref, bf_ref, o_ref, *, apply_final_ln):
    # Fused: relu(x @ W1 + b1) @ W2 + b2, residual, LayerNorm2,
    # optionally the encoder's final LayerNorm (last layer only, static flag).
    x32 = x_ref[...]                                   # (T, D) fp32
    xb = x32.astype(BF16)
    hid = jnp.dot(xb, w1_ref[...], preferred_element_type=F32) + b1_ref[...]
    hid = jnp.maximum(hid, 0.0).astype(BF16)           # relu; bf16 for 2nd MXU pass
    y = jnp.dot(hid, w2_ref[...], preferred_element_type=F32) + b2_ref[...]
    res = x32 + y
    mu = jnp.mean(res, axis=-1, keepdims=True)
    var = jnp.mean((res - mu) ** 2, axis=-1, keepdims=True)
    out = (res - mu) * lax.rsqrt(var + LN_EPS) * g_ref[...] + b_ref[...]
    if apply_final_ln:                                 # static python bool
        mu2 = jnp.mean(out, axis=-1, keepdims=True)
        var2 = jnp.mean((out - mu2) ** 2, axis=-1, keepdims=True)
        out = (out - mu2) * lax.rsqrt(var2 + LN_EPS) * gf_ref[...] + bf_ref[...]
    o_ref[...] = out.astype(o_ref.dtype)


def layernorm_kernel(x_ref, g_ref, b_ref, o_ref):
    # Only used when there are zero encoder layers but a final norm is requested.
    h = x_ref[...].astype(F32)
    mu = jnp.mean(h, axis=-1, keepdims=True)
    var = jnp.mean((h - mu) ** 2, axis=-1, keepdims=True)
    o_ref[...] = ((h - mu) * lax.rsqrt(var + LN_EPS) * g_ref[...]
                  + b_ref[...]).astype(o_ref.dtype)


# ----------------------------- wrappers -----------------------------

def _token_tile(n, dff):
    # Largest multiple-of-8 tile <= FFN_TILE_TARGET keeping the (T, dff) fp32+bf16
    # hidden intermediate ~<= 12 MiB; use full n when small (block == full dim is
    # always legal even if n is not a multiple of 8).
    cap = max(256, (12 * 1024 * 1024) // (6 * max(dff, 1)))
    t = min(FFN_TILE_TARGET, cap)
    t = max(8, (t // 8) * 8)
    return n if n <= t else t


def pallas_attention_block(x, pos, p, nhead):
    # x, pos: (B, S, D) fp32; returns LN1(x + attn_out(x, pos)) as (B, S, D) fp32.
    B, S, D = x.shape
    Dh = D // nhead
    scale = 1.0 / (Dh ** 0.5)
    blk = pl.BlockSpec((1, S, D), lambda b: (b, 0, 0))
    return pl.pallas_call(
        functools.partial(attn_fused_kernel, nhead=nhead, scale=scale,
                          q_tile=min(S, Q_TILE)),
        grid=(B,),
        in_specs=[blk, blk,
                  _resident(p["wq_h"]), _resident(p["bq_h"]),
                  _resident(p["wk_h"]), _resident(p["bk_h"]),
                  _resident(p["wv_h"]), _resident(p["bv_h"]),
                  _resident(p["wo_h"]), _resident(p["bo"]),
                  _resident(p["ln1_g"]), _resident(p["ln1_b"])],
        out_specs=blk,
        out_shape=jax.ShapeDtypeStruct((B, S, D), F32),
        scratch_shapes=[pltpu.VMEM((nhead, S, Dh), BF16),
                        pltpu.VMEM((nhead, S, Dh), BF16),
                        pltpu.VMEM((nhead, S, Dh), BF16)],
        compiler_params=_cparams(1),
    )(x, pos, p["wq_h"], p["bq_h"], p["wk_h"], p["bk_h"],
      p["wv_h"], p["bv_h"], p["wo_h"], p["bo"], p["ln1_g"], p["ln1_b"])


def pallas_ffn_ln(x, p, final_norm=None):
    # x: (N, D) fp32 flat tokens; large lane-dense token tiles, cdiv grid with
    # masked remainder tile.  Optionally fuses the encoder's final LayerNorm.
    N, D = x.shape
    dff = p["w1"].shape[1]
    T = _token_tile(N, dff)
    tok = pl.BlockSpec((T, D), lambda i: (i, 0))
    apply_final = final_norm is not None
    gf = final_norm["g"] if apply_final else p["ln2_g"]
    bf = final_norm["b"] if apply_final else p["ln2_b"]
    return pl.pallas_call(
        functools.partial(ffn_ln_kernel, apply_final_ln=apply_final),
        grid=(pl.cdiv(N, T),),
        in_specs=[tok,
                  _resident(p["w1"]), _resident(p["b1"]),
                  _resident(p["w2"]), _resident(p["b2"]),
                  _resident(p["ln2_g"]), _resident(p["ln2_b"]),
                  _resident(gf), _resident(bf)],
        out_specs=tok,
        out_shape=jax.ShapeDtypeStruct((N, D), F32),
        compiler_params=_cparams(1),
    )(x, p["w1"], p["b1"], p["w2"], p["b2"], p["ln2_g"], p["ln2_b"], gf, bf)


def pallas_layernorm(x, g, b):
    N, D = x.shape
    T = _token_tile(N, 1)
    tok = pl.BlockSpec((T, D), lambda i: (i, 0))
    return pl.pallas_call(
        layernorm_kernel,
        grid=(pl.cdiv(N, T),),
        in_specs=[tok, _resident(g), _resident(b)],
        out_specs=tok,
        out_shape=jax.ShapeDtypeStruct((N, D), F32),
        compiler_params=_cparams(1),
    )(x, g, b)


# ----------------------------- encoder -----------------------------

def _split_heads_for_kernel(p, nhead):
    # Re-arrange per-layer params (right-multiply weight layout) into the head-major
    # layouts consumed by the fused attention kernel.  Tiny reshapes, done outside
    # the kernels once per layer call.
    D = p["wq"].shape[0]
    Dh = D // nhead
    sw = lambda w: w.reshape(D, nhead, Dh).transpose(1, 0, 2).astype(BF16)  # (nhead, D, Dh)
    sb = lambda b: b.reshape(nhead, 1, Dh).astype(F32)                       # (nhead, 1, Dh)
    q = dict(p)
    q["wq_h"], q["bq_h"] = sw(p["wq"]), sb(p["bq"])
    q["wk_h"], q["bk_h"] = sw(p["wk"]), sb(p["bk"])
    q["wv_h"], q["bv_h"] = sw(p["wv"]), sb(p["bv"])
    q["wo_h"] = p["wo"].reshape(nhead, Dh, D).astype(BF16)                   # (nhead, Dh, D)
    return q


def encoder_layer_forward(x3, pos3, p, nhead, final_norm=None):
    # x3, pos3: (B, S, D) fp32
    B, S, D = x3.shape
    x1 = pallas_attention_block(x3, pos3, p, nhead)                   # QKV+attn+LN1
    x2 = pallas_ffn_ln(x1.reshape(B * S, D), p, final_norm=final_norm)  # FFN+LN2(+final)
    return x2.reshape(B, S, D)


def transformer_encoder_forward(x, pos_embed, layer_params, final_norm, nhead):
    # x, pos_embed: (S, B, D) -- DETR (HW, B, C) convention.
    S, B, D = x.shape
    # single layout change to batch-major (B, S, D); residual stream kept fp32
    x3 = x.transpose(1, 0, 2).astype(F32)
    pos3 = pos_embed.transpose(1, 0, 2).astype(F32)

    n_layers = len(layer_params)
    out = x3
    for li, p in enumerate(layer_params):
        pk = _split_heads_for_kernel(p, nhead)
        fuse_final = final_norm if (li == n_layers - 1) else None
        out = encoder_layer_forward(out, pos3, pk, nhead, final_norm=fuse_final)

    if n_layers == 0 and final_norm is not None:
        out = pallas_layernorm(out.reshape(B * S, D),
                               final_norm["g"], final_norm["b"]).reshape(B, S, D)

    return out.transpose(1, 0, 2)                                      # (S, B, D) fp32


# ----------------------------- params -----------------------------

def init_layer_params(key, d_model, dff):
    ks = jax.random.split(key, 6)
    w = lambda k, s: (jax.random.normal(k, s, F32) * 0.02).astype(BF16)  # bf16 MXU weights
    zeros = lambda n: jnp.zeros((1, n), F32)
    ones = lambda n: jnp.ones((1, n), F32)
    return dict(
        wq=w(ks[0], (d_model, d_model)), bq=zeros(d_model),
        wk=w(ks[1], (d_model, d_model)), bk=zeros(d_model),
        wv=w(ks[2], (d_model, d_model)), bv=zeros(d_model),
        wo=w(ks[3], (d_model, d_model)), bo=zeros(d_model),
        w1=w(ks[4], (d_model, dff)), b1=zeros(dff),
        w2=w(ks[5], (dff, d_model)), b2=zeros(d_model),
        ln1_g=ones(d_model), ln1_b=zeros(d_model),
        ln2_g=ones(d_model), ln2_b=zeros(d_model),
    )


# ----------------------------- main -----------------------------

if __name__ == "__main__":
    # Small demo config (harness requirement).  NOTE: benchmark/tune at realistic DETR
    # shapes (d_model=256, nhead=8, dim_feedforward=2048, S~850, B=1..8) -- this demo
    # size is far below TPU tile minimums and is only a correctness smoke test.
    num_layers, d_model, nhead, dff = 2, 32, 4, 64
    S, B = 16, 2

    key = jax.random.PRNGKey(0)
    k_x, k_pos, k_params = jax.random.split(key, 3)
    x = jax.random.normal(k_x, (S, B, d_model), F32)
    pos = jax.random.normal(k_pos, (S, B, d_model), F32)

    layer_keys = jax.random.split(k_params, num_layers)
    layer_params = [init_layer_params(k, d_model, dff) for k in layer_keys]
    final_norm = {"g": jnp.ones((1, d_model), F32),
                  "b": jnp.zeros((1, d_model), F32)}

    fwd = jax.jit(functools.partial(transformer_encoder_forward, nhead=nhead))
    out = fwd(x, pos, layer_params, final_norm)
    jax.block_until_ready(out)
    assert out.shape == (S, B, d_model)
    assert bool(jnp.all(jnp.isfinite(out)))
    print("KERNEL_OK")
</pallas_src>

<mosaic_0001>
module attributes {stable_mosaic.version = 11 : i64} {
  func.func @ffn_ln_kernel(%arg0: i32, %arg1: memref<32x32xf32, #tpu.memory_space<vmem>>, %arg2: memref<32x64xbf16, #tpu.memory_space<vmem>>, %arg3: memref<1x64xf32, #tpu.memory_space<vmem>>, %arg4: memref<64x32xbf16, #tpu.memory_space<vmem>>, %arg5: memref<1x32xf32, #tpu.memory_space<vmem>>, %arg6: memref<1x32xf32, #tpu.memory_space<vmem>>, %arg7: memref<1x32xf32, #tpu.memory_space<vmem>>, %arg8: memref<1x32xf32, #tpu.memory_space<vmem>>, %arg9: memref<1x32xf32, #tpu.memory_space<vmem>>, %arg10: memref<32x32xf32, #tpu.memory_space<vmem>>) attributes {dimension_semantics = [#tpu.dimension_semantics<parallel>], iteration_bounds = array<i64: 1>, scalar_prefetch = 0 : i64, scratch_operands = 0 : i64, tpu.core_type = #tpu.core_type<tc>, window_params = [{transform_indices = @transform_0, window_bounds = array<i64: 32, 32>}, {pipeline_mode = #tpu.pipeline_mode<synchronous>, transform_indices = @transform_1, window_bounds = array<i64: 32, 64>}, {pipeline_mode = #tpu.pipeline_mode<synchronous>, transform_indices = @transform_2, window_bounds = array<i64: 1, 64>}, {pipeline_mode = #tpu.pipeline_mode<synchronous>, transform_indices = @transform_3, window_bounds = array<i64: 64, 32>}, {pipeline_mode = #tpu.pipeline_mode<synchronous>, transform_indices = @transform_4, window_bounds = array<i64: 1, 32>}, {pipeline_mode = #tpu.pipeline_mode<synchronous>, transform_indices = @transform_5, window_bounds = array<i64: 1, 32>}, {pipeline_mode = #tpu.pipeline_mode<synchronous>, transform_indices = @transform_6, window_bounds = array<i64: 1, 32>}, {pipeline_mode = #tpu.pipeline_mode<synchronous>, transform_indices = @transform_7, window_bounds = array<i64: 1, 32>}, {pipeline_mode = #tpu.pipeline_mode<synchronous>, transform_indices = @transform_8, window_bounds = array<i64: 1, 32>}, {transform_indices = @transform_9, window_bounds = array<i64: 32, 32>}]} {
    %c0 = arith.constant 0 : index
    %c0_0 = arith.constant 0 : index
    %0 = vector.load %arg1[%c0, %c0_0] : memref<32x32xf32, #tpu.memory_space<vmem>>, vector<32x32xf32>
    %1 = arith.truncf %0 : vector<32x32xf32> to vector<32x32xbf16>
    %c0_1 = arith.constant 0 : index
    %c0_2 = arith.constant 0 : index
    %2 = vector.load %arg2[%c0_1, %c0_2] : memref<32x64xbf16, #tpu.memory_space<vmem>>, vector<32x64xbf16>
    %cst = arith.constant dense<0.000000e+00> : vector<32x64xf32>
    %3 = tpu.matmul %1, %2, %cst {dimension_numbers = #tpu.dot_dimension_numbers<[1], [0], [0], [1], [0, 0, 1, 1], [], []>} : vector<32x32xbf16>, vector<32x64xbf16>, vector<32x64xf32> -> vector<32x64xf32>
    %c0_3 = arith.constant 0 : index
    %c0_4 = arith.constant 0 : index
    %4 = vector.load %arg3[%c0_3, %c0_4] : memref<1x64xf32, #tpu.memory_space<vmem>>, vector<1x64xf32>
    %5 = vector.broadcast %4 : vector<1x64xf32> to vector<32x64xf32>
    %6 = arith.addf %3, %5 : vector<32x64xf32>
    %cst_5 = arith.constant 0.000000e+00 : f32
    %7 = vector.broadcast %cst_5 : f32 to vector<32x64xf32>
    %8 = arith.maximumf %6, %7 : vector<32x64xf32>
    %9 = arith.truncf %8 : vector<32x64xf32> to vector<32x64xbf16>
    %c0_6 = arith.constant 0 : index
    %c0_7 = arith.constant 0 : index
    %10 = vector.load %arg4[%c0_6, %c0_7] : memref<64x32xbf16, #tpu.memory_space<vmem>>, vector<64x32xbf16>
    %cst_8 = arith.constant dense<0.000000e+00> : vector<32x32xf32>
    %11 = tpu.matmul %9, %10, %cst_8 {dimension_numbers = #tpu.dot_dimension_numbers<[1], [0], [0], [1], [0, 0, 1, 1], [], []>} : vector<32x64xbf16>, vector<64x32xbf16>, vector<32x32xf32> -> vector<32x32xf32>
    %c0_9 = arith.constant 0 : index
    %c0_10 = arith.constant 0 : index
    %12 = vector.load %arg5[%c0_9, %c0_10] : memref<1x32xf32, #tpu.memory_space<vmem>>, vector<1x32xf32>
    %13 = vector.broadcast %12 : vector<1x32xf32> to vector<32x32xf32>
    %14 = arith.addf %11, %13 : vector<32x32xf32>
    %15 = arith.addf %0, %14 : vector<32x32xf32>
    %cst_11 = arith.constant dense<0.000000e+00> : vector<32xf32>
    %16 = vector.multi_reduction <add>, %15, %cst_11 [1] : vector<32x32xf32> to vector<32xf32>
    %17 = vector.shape_cast %16 : vector<32xf32> to vector<32x1xf32>
    %cst_12 = arith.constant 3.200000e+01 : f32
    %18 = vector.broadcast %cst_12 : f32 to vector<32x1xf32>
    %19 = arith.divf %17, %18 : vector<32x1xf32>
    %20 = vector.broadcast %19 : vector<32x1xf32> to vector<32x32xf32>
    %21 = arith.subf %15, %20 : vector<32x32xf32>
    %22 = arith.mulf %21, %21 : vector<32x32xf32>
    %cst_13 = arith.constant dense<0.000000e+00> : vector<32xf32>
    %23 = vector.multi_reduction <add>, %22, %cst_13 [1] : vector<32x32xf32> to vector<32xf32>
    %24 = vector.shape_cast %23 : vector<32xf32> to vector<32x1xf32>
    %cst_14 = arith.constant 3.200000e+01 : f32
    %25 = vector.broadcast %cst_14 : f32 to vector<32x1xf32>
    %26 = arith.divf %24, %25 : vector<32x1xf32>
    %27 = vector.broadcast %19 : vector<32x1xf32> to vector<32x32xf32>
    %28 = arith.subf %15, %27 : vector<32x32xf32>
    %cst_15 = arith.constant 9.99999974E-6 : f32
    %29 = vector.broadcast %cst_15 : f32 to vector<32x1xf32>
    %30 = arith.addf %26, %29 : vector<32x1xf32>
    %31 = math.rsqrt %30 : vector<32x1xf32>
    %32 = vector.broadcast %31 : vector<32x1xf32> to vector<32x32xf32>
    %33 = arith.mulf %28, %32 : vector<32x32xf32>
    %c0_16 = arith.constant 0 : index
    %c0_17 = arith.constant 0 : index
    %34 = vector.load %arg6[%c0_16, %c0_17] : memref<1x32xf32, #tpu.memory_space<vmem>>, vector<1x32xf32>
    %35 = vector.broadcast %34 : vector<1x32xf32> to vector<32x32xf32>
    %36 = arith.mulf %33, %35 : vector<32x32xf32>
    %c0_18 = arith.constant 0 : index
    %c0_19 = arith.constant 0 : index
    %37 = vector.load %arg7[%c0_18, %c0_19] : memref<1x32xf32, #tpu.memory_space<vmem>>, vector<1x32xf32>
    %38 = vector.broadcast %37 : vector<1x32xf32> to vector<32x32xf32>
    %39 = arith.addf %36, %38 : vector<32x32xf32>
    %cst_20 = arith.constant dense<0.000000e+00> : vector<32xf32>
    %40 = vector.multi_reduction <add>, %39, %cst_20 [1] : vector<32x32xf32> to vector<32xf32>
    %41 = vector.shape_cast %40 : vector<32xf32> to vector<32x1xf32>
    %cst_21 = arith.constant 3.200000e+01 : f32
    %42 = vector.broadcast %cst_21 : f32 to vector<32x1xf32>
    %43 = arith.divf %41, %42 : vector<32x1xf32>
    %44 = vector.broadcast %43 : vector<32x1xf32> to vector<32x32xf32>
    %45 = arith.subf %39, %44 : vector<32x32xf32>
    %46 = arith.mulf %45, %45 : vector<32x32xf32>
    %cst_22 = arith.constant dense<0.000000e+00> : vector<32xf32>
    %47 = vector.multi_reduction <add>, %46, %cst_22 [1] : vector<32x32xf32> to vector<32xf32>
    %48 = vector.shape_cast %47 : vector<32xf32> to vector<32x1xf32>
    %cst_23 = arith.constant 3.200000e+01 : f32
    %49 = vector.broadcast %cst_23 : f32 to vector<32x1xf32>
    %50 = arith.divf %48, %49 : vector<32x1xf32>
    %51 = vector.broadcast %43 : vector<32x1xf32> to vector<32x32xf32>
    %52 = arith.subf %39, %51 : vector<32x32xf32>
    %cst_24 = arith.constant 9.99999974E-6 : f32
    %53 = vector.broadcast %cst_24 : f32 to vector<32x1xf32>
    %54 = arith.addf %50, %53 : vector<32x1xf32>
    %55 = math.rsqrt %54 : vector<32x1xf32>
    %56 = vector.broadcast %55 : vector<32x1xf32> to vector<32x32xf32>
    %57 = arith.mulf %52, %56 : vector<32x32xf32>
    %c0_25 = arith.constant 0 : index
    %c0_26 = arith.constant 0 : index
    %58 = vector.load %arg8[%c0_25, %c0_26] : memref<1x32xf32, #tpu.memory_space<vmem>>, vector<1x32xf32>
    %59 = vector.broadcast %58 : vector<1x32xf32> to vector<32x32xf32>
    %60 = arith.mulf %57, %59 : vector<32x32xf32>
    %c0_27 = arith.constant 0 : index
    %c0_28 = arith.constant 0 : index
    %61 = vector.load %arg9[%c0_27, %c0_28] : memref<1x32xf32, #tpu.memory_space<vmem>>, vector<1x32xf32>
    %62 = vector.broadcast %61 : vector<1x32xf32> to vector<32x32xf32>
    %63 = arith.addf %60, %62 : vector<32x32xf32>
    %c0_29 = arith.constant 0 : index
    %c0_30 = arith.constant 0 : index
    %64 = vector.load %arg10[%c0_29, %c0_30] : memref<32x32xf32, #tpu.memory_space<vmem>>, vector<32x32xf32>
    tpu.vector_store %arg10[%c0_29, %c0_30], %63 {strides = array<i32>} : memref<32x32xf32, #tpu.memory_space<vmem>>, vector<32x32xf32>,
    return
  }
  func.func @transform_0(%arg0: i32) -> (i32, i32) {
    %c0_i32 = arith.constant 0 : i32
    %c0_i32_0 = arith.constant 0 : i32
    return %arg0, %c0_i32 : i32, i32
  }
  func.func @transform_1(%arg0: i32) -> (i32, i32) {
    %c0_i32 = arith.constant 0 : i32
    %c0_i32_0 = arith.constant 0 : i32
    %c0_i32_1 = arith.constant 0 : i32
    return %c0_i32, %c0_i32_0 : i32, i32
  }
  func.func @transform_2(%arg0: i32) -> (i32, i32) {
    %c0_i32 = arith.constant 0 : i32
    %c0_i32_0 = arith.constant 0 : i32
    %c0_i32_1 = arith.constant 0 : i32
    return %c0_i32, %c0_i32_0 : i32, i32
  }
  func.func @transform_3(%arg0: i32) -> (i32, i32) {
    %c0_i32 = arith.constant 0 : i32
    %c0_i32_0 = arith.constant 0 : i32
    %c0_i32_1 = arith.constant 0 : i32
    return %c0_i32, %c0_i32_0 : i32, i32
  }
  func.func @transform_4(%arg0: i32) -> (i32, i32) {
    %c0_i32 = arith.constant 0 : i32
    %c0_i32_0 = arith.constant 0 : i32
    %c0_i32_1 = arith.constant 0 : i32
    return %c0_i32, %c0_i32_0 : i32, i32
  }
  func.func @transform_5(%arg0: i32) -> (i32, i32) {
    %c0_i32 = arith.constant 0 : i32
    %c0_i32_0 = arith.constant 0 : i32
    %c0_i32_1 = arith.constant 0 : i32
    return %c0_i32, %c0_i32_0 : i32, i32
  }
  func.func @transform_6(%arg0: i32) -> (i32, i32) {
    %c0_i32 = arith.constant 0 : i32
    %c0_i32_0 = arith.constant 0 : i32
    %c0_i32_1 = arith.constant 0 : i32
    return %c0_i32, %c0_i32_0 : i32, i32
  }
  func.func @transform_7(%arg0: i32) -> (i32, i32) {
    %c0_i32 = arith.constant 0 : i32
    %c0_i32_0 = arith.constant 0 : i32
    %c0_i32_1 = arith.constant 0 : i32
    return %c0_i32, %c0_i32_0 : i32, i32
  }
  func.func @transform_8(%arg0: i32) -> (i32, i32) {
    %c0_i32 = arith.constant 0 : i32
    %c0_i32_0 = arith.constant 0 : i32
    %c0_i32_1 = arith.constant 0 : i32
    return %c0_i32, %c0_i32_0 : i32, i32
  }
  func.func @transform_9(%arg0: i32) -> (i32, i32) {
    %c0_i32 = arith.constant 0 : i32
    %c0_i32_0 = arith.constant 0 : i32
    return %arg0, %c0_i32 : i32, i32
  }
}

module attributes {stable_mosaic.version = 11 : i64} {
  func.func @ffn_ln_kernel(%arg0: i32, %arg1: memref<32x32xf32, #tpu.memory_space<vmem>>, %arg2: memref<32x64xbf16, #tpu.memory_space<vmem>>, %arg3: memref<1x64xf32, #tpu.memory_space<vmem>>, %arg4: memref<64x32xbf16, #tpu.memory_space<vmem>>, %arg5: memref<1x32xf32, #tpu.memory_space<vmem>>, %arg6: memref<1x32xf32, #tpu.memory_space<vmem>>, %arg7: memref<1x32xf32, #tpu.memory_space<vmem>>, %arg8: memref<1x32xf32, #tpu.memory_space<vmem>>, %arg9: memref<1x32xf32, #tpu.memory_space<vmem>>, %arg10: memref<32x32xf32, #tpu.memory_space<vmem>>) attributes {dimension_semantics = [#tpu.dimension_semantics<parallel>], iteration_bounds = array<i64: 1>, scalar_prefetch = 0 : i64, scratch_operands = 0 : i64, tpu.core_type = #tpu.core_type<tc>, window_params = [{transform_indices = @transform_0, window_bounds = array<i64: 32, 32>}, {pipeline_mode = #tpu.pipeline_mode<synchronous>, transform_indices = @transform_1, window_bounds = array<i64: 32, 64>}, {pipeline_mode = #tpu.pipeline_mode<synchronous>, transform_indices = @transform_2, window_bounds = array<i64: 1, 64>}, {pipeline_mode = #tpu.pipeline_mode<synchronous>, transform_indices = @transform_3, window_bounds = array<i64: 64, 32>}, {pipeline_mode = #tpu.pipeline_mode<synchronous>, transform_indices = @transform_4, window_bounds = array<i64: 1, 32>}, {pipeline_mode = #tpu.pipeline_mode<synchronous>, transform_indices = @transform_5, window_bounds = array<i64: 1, 32>}, {pipeline_mode = #tpu.pipeline_mode<synchronous>, transform_indices = @transform_6, window_bounds = array<i64: 1, 32>}, {pipeline_mode = #tpu.pipeline_mode<synchronous>, transform_indices = @transform_7, window_bounds = array<i64: 1, 32>}, {pipeline_mode = #tpu.pipeline_mode<synchronous>, transform_indices = @transform_8, window_bounds = array<i64: 1, 32>}, {transform_indices = @transform_9, window_bounds = array<i64: 32, 32>}]} {
    %c0 = arith.constant 0 : index
    %c0_0 = arith.constant 0 : index
    %0 = vector.load %arg1[%c0, %c0_0] : memref<32x32xf32, #tpu.memory_space<vmem>>, vector<32x32xf32>
    %1 = arith.truncf %0 : vector<32x32xf32> to vector<32x32xbf16>
    %c0_1 = arith.constant 0 : index
    %c0_2 = arith.constant 0 : index
    %2 = vector.load %arg2[%c0_1, %c0_2] : memref<32x64xbf16, #tpu.memory_space<vmem>>, vector<32x64xbf16>
    %cst = arith.constant dense<0.000000e+00> : vector<32x64xf32>
    %3 = tpu.matmul %1, %2, %cst {dimension_numbers = #tpu.dot_dimension_numbers<[1], [0], [0], [1], [0, 0, 1, 1], [], []>} : vector<32x32xbf16>, vector<32x64xbf16>, vector<32x64xf32> -> vector<32x64xf32>
    %c0_3 = arith.constant 0 : index
    %c0_4 = arith.constant 0 : index
    %4 = vector.load %arg3[%c0_3, %c0_4] : memref<1x64xf32, #tpu.memory_space<vmem>>, vector<1x64xf32>
    %5 = vector.broadcast %4 : vector<1x64xf32> to vector<32x64xf32>
    %6 = arith.addf %3, %5 : vector<32x64xf32>
    %cst_5 = arith.constant 0.000000e+00 : f32
    %7 = vector.broadcast %cst_5 : f32 to vector<32x64xf32>
    %8 = arith.maximumf %6, %7 : vector<32x64xf32>
    %9 = arith.truncf %8 : vector<32x64xf32> to vector<32x64xbf16>
    %c0_6 = arith.constant 0 : index
    %c0_7 = arith.constant 0 : index
    %10 = vector.load %arg4[%c0_6, %c0_7] : memref<64x32xbf16, #tpu.memory_space<vmem>>, vector<64x32xbf16>
    %cst_8 = arith.constant dense<0.000000e+00> : vector<32x32xf32>
    %11 = tpu.matmul %9, %10, %cst_8 {dimension_numbers = #tpu.dot_dimension_numbers<[1], [0], [0], [1], [0, 0, 1, 1], [], []>} : vector<32x64xbf16>, vector<64x32xbf16>, vector<32x32xf32> -> vector<32x32xf32>
    %c0_9 = arith.constant 0 : index
    %c0_10 = arith.constant 0 : index
    %12 = vector.load %arg5[%c0_9, %c0_10] : memref<1x32xf32, #tpu.memory_space<vmem>>, vector<1x32xf32>
    %13 = vector.broadcast %12 : vector<1x32xf32> to vector<32x32xf32>
    %14 = arith.addf %11, %13 : vector<32x32xf32>
    %15 = arith.addf %0, %14 : vector<32x32xf32>
    %cst_11 = arith.constant dense<0.000000e+00> : vector<32xf32>
    %16 = vector.multi_reduction <add>, %15, %cst_11 [1] : vector<32x32xf32> to vector<32xf32>
    %17 = vector.shape_cast %16 : vector<32xf32> to vector<32x1xf32>
    %cst_12 = arith.constant 3.200000e+01 : f32
    %18 = vector.broadcast %cst_12 : f32 to vector<32x1xf32>
    %19 = arith.divf %17, %18 : vector<32x1xf32>
    %20 = vector.broadcast %19 : vector<32x1xf32> to vector<32x32xf32>
    %21 = arith.subf %15, %20 : vector<32x32xf32>
    %22 = arith.mulf %21, %21 : vector<32x32xf32>
    %cst_13 = arith.constant dense<0.000000e+00> : vector<32xf32>
    %23 = vector.multi_reduction <add>, %22, %cst_13 [1] : vector<32x32xf32> to vector<32xf32>
    %24 = vector.shape_cast %23 : vector<32xf32> to vector<32x1xf32>
    %cst_14 = arith.constant 3.200000e+01 : f32
    %25 = vector.broadcast %cst_14 : f32 to vector<32x1xf32>
    %26 = arith.divf %24, %25 : vector<32x1xf32>
    %27 = vector.broadcast %19 : vector<32x1xf32> to vector<32x32xf32>
    %28 = arith.subf %15, %27 : vector<32x32xf32>
    %cst_15 = arith.constant 9.99999974E-6 : f32
    %29 = vector.broadcast %cst_15 : f32 to vector<32x1xf32>
    %30 = arith.addf %26, %29 : vector<32x1xf32>
    %31 = math.rsqrt %30 : vector<32x1xf32>
    %32 = vector.broadcast %31 : vector<32x1xf32> to vector<32x32xf32>
    %33 = arith.mulf %28, %32 : vector<32x32xf32>
    %c0_16 = arith.constant 0 : index
    %c0_17 = arith.constant 0 : index
    %34 = vector.load %arg6[%c0_16, %c0_17] : memref<1x32xf32, #tpu.memory_space<vmem>>, vector<1x32xf32>
    %35 = vector.broadcast %34 : vector<1x32xf32> to vector<32x32xf32>
    %36 = arith.mulf %33, %35 : vector<32x32xf32>
    %c0_18 = arith.constant 0 : index
    %c0_19 = arith.constant 0 : index
    %37 = vector.load %arg7[%c0_18, %c0_19] : memref<1x32xf32, #tpu.memory_space<vmem>>, vector<1x32xf32>
    %38 = vector.broadcast %37 : vector<1x32xf32> to vector<32x32xf32>
    %39 = arith.addf %36, %38 : vector<32x32xf32>
    %c0_20 = arith.constant 0 : index
    %c0_21 = arith.constant 0 : index
    %40 = vector.load %arg10[%c0_20, %c0_21] : memref<32x32xf32, #tpu.memory_space<vmem>>, vector<32x32xf32>
    tpu.vector_store %arg10[%c0_20, %c0_21], %39 {strides = array<i32>} : memref<32x32xf32, #tpu.memory_space<vmem>>, vector<32x32xf32>,
    return
  }
  func.func @transform_0(%arg0: i32) -> (i32, i32) {
    %c0_i32 = arith.constant 0 : i32
    %c0_i32_0 = arith.constant 0 : i32
    return %arg0, %c0_i32 : i32, i32
  }
  func.func @transform_1(%arg0: i32) -> (i32, i32) {
    %c0_i32 = arith.constant 0 : i32
    %c0_i32_0 = arith.constant 0 : i32
    %c0_i32_1 = arith.constant 0 : i32
    return %c0_i32, %c0_i32_0 : i32, i32
  }
  func.func @transform_2(%arg0: i32) -> (i32, i32) {
    %c0_i32 = arith.constant 0 : i32
    %c0_i32_0 = arith.constant 0 : i32
    %c0_i32_1 = arith.constant 0 : i32
    return %c0_i32, %c0_i32_0 : i32, i32
  }
  func.func @transform_3(%arg0: i32) -> (i32, i32) {
    %c0_i32 = arith.constant 0 : i32
    %c0_i32_0 = arith.constant 0 : i32
    %c0_i32_1 = arith.constant 0 : i32
    return %c0_i32, %c0_i32_0 : i32, i32
  }
  func.func @transform_4(%arg0: i32) -> (i32, i32) {
    %c0_i32 = arith.constant 0 : i32
    %c0_i32_0 = arith.constant 0 : i32
    %c0_i32_1 = arith.constant 0 : i32
    return %c0_i32, %c0_i32_0 : i32, i32
  }
  func.func @transform_5(%arg0: i32) -> (i32, i32) {
    %c0_i32 = arith.constant 0 : i32
    %c0_i32_0 = arith.constant 0 : i32
    %c0_i32_1 = arith.constant 0 : i32
    return %c0_i32, %c0_i32_0 : i32, i32
  }
  func.func @transform_6(%arg0: i32) -> (i32, i32) {
    %c0_i32 = arith.constant 0 : i32
    %c0_i32_0 = arith.constant 0 : i32
    %c0_i32_1 = arith.constant 0 : i32
    return %c0_i32, %c0_i32_0 : i32, i32
  }
  func.func @transform_7(%arg0: i32) -> (i32, i32) {
    %c0_i32 = arith.constant 0 : i32
    %c0_i32_0 = arith.constant 0 : i32
    %c0_i32_1 = arith.constant 0 : i32
    return %c0_i32, %c0_i32_0 : i32, i32
  }
  func.func @transform_8(%arg0: i32) -> (i32, i32) {
    %c0_i32 = arith.constant 0 : i32
    %c0_i32_0 = arith.constant 0 : i32
    %c0_i32_1 = arith.constant 0 : i32
    return %c0_i32, %c0_i32_0 : i32, i32
  }
  func.func @transform_9(%arg0: i32) -> (i32, i32) {
    %c0_i32 = arith.constant 0 : i32
    %c0_i32_0 = arith.constant 0 : i32
    return %arg0, %c0_i32 : i32, i32
  }
}

module attributes {stable_mosaic.version = 11 : i64} {
  func.func @attn_fused_kernel(%arg0: i32, %arg1: memref<1x16x32xf32, #tpu.memory_space<vmem>>, %arg2: memref<1x16x32xf32, #tpu.memory_space<vmem>>, %arg3: memref<4x32x8xbf16, #tpu.memory_space<vmem>>, %arg4: memref<4x1x8xf32, #tpu.memory_space<vmem>>, %arg5: memref<4x32x8xbf16, #tpu.memory_space<vmem>>, %arg6: memref<4x1x8xf32, #tpu.memory_space<vmem>>, %arg7: memref<4x32x8xbf16, #tpu.memory_space<vmem>>, %arg8: memref<4x1x8xf32, #tpu.memory_space<vmem>>, %arg9: memref<4x8x32xbf16, #tpu.memory_space<vmem>>, %arg10: memref<1x32xf32, #tpu.memory_space<vmem>>, %arg11: memref<1x32xf32, #tpu.memory_space<vmem>>, %arg12: memref<1x32xf32, #tpu.memory_space<vmem>>, %arg13: memref<1x16x32xf32, #tpu.memory_space<vmem>>, %arg14: memref<4x16x8xbf16, #tpu.memory_space<vmem>>, %arg15: memref<4x16x8xbf16, #tpu.memory_space<vmem>>, %arg16: memref<4x16x8xbf16, #tpu.memory_space<vmem>>) attributes {dimension_semantics = [#tpu.dimension_semantics<parallel>], iteration_bounds = array<i64: 2>, scalar_prefetch = 0 : i64, scratch_operands = 3 : i64, tpu.core_type = #tpu.core_type<tc>, window_params = [{transform_indices = @transform_0, window_bounds = array<i64: 1, 16, 32>}, {transform_indices = @transform_1, window_bounds = array<i64: 1, 16, 32>}, {pipeline_mode = #tpu.pipeline_mode<synchronous>, transform_indices = @transform_2, window_bounds = array<i64: 4, 32, 8>}, {pipeline_mode = #tpu.pipeline_mode<synchronous>, transform_indices = @transform_3, window_bounds = array<i64: 4, 1, 8>}, {pipeline_mode = #tpu.pipeline_mode<synchronous>, transform_indices = @transform_4, window_bounds = array<i64: 4, 32, 8>}, {pipeline_mode = #tpu.pipeline_mode<synchronous>, transform_indices = @transform_5, window_bounds = array<i64: 4, 1, 8>}, {pipeline_mode = #tpu.pipeline_mode<synchronous>, transform_indices = @transform_6, window_bounds = array<i64: 4, 32, 8>}, {pipeline_mode = #tpu.pipeline_mode<synchronous>, transform_indices = @transform_7, window_bounds = array<i64: 4, 1, 8>}, {pipeline_mode = #tpu.pipeline_mode<synchronous>, transform_indices = @transform_8, window_bounds = array<i64: 4, 8, 32>}, {pipeline_mode = #tpu.pipeline_mode<synchronous>, transform_indices = @transform_9, window_bounds = array<i64: 1, 32>}, {pipeline_mode = #tpu.pipeline_mode<synchronous>, transform_indices = @transform_10, window_bounds = array<i64: 1, 32>}, {pipeline_mode = #tpu.pipeline_mode<synchronous>, transform_indices = @transform_11, window_bounds = array<i64: 1, 32>}, {transform_indices = @transform_12, window_bounds = array<i64: 1, 16, 32>}]} {
    %c0 = arith.constant 0 : index
    %c0_0 = arith.constant 0 : index
    %c0_1 = arith.constant 0 : index
    %0 = vector.load %arg1[%c0, %c0_0, %c0_1] : memref<1x16x32xf32, #tpu.memory_space<vmem>>, vector<1x16x32xf32>
    %1 = vector.shape_cast %0 : vector<1x16x32xf32> to vector<16x32xf32>
    %c0_2 = arith.constant 0 : index
    %c0_3 = arith.constant 0 : index
    %c0_4 = arith.constant 0 : index
    %2 = vector.load %arg2[%c0_2, %c0_3, %c0_4] : memref<1x16x32xf32, #tpu.memory_space<vmem>>, vector<1x16x32xf32>
    %3 = vector.shape_cast %2 : vector<1x16x32xf32> to vector<16x32xf32>
    %4 = arith.addf %1, %3 : vector<16x32xf32>
    %5 = arith.truncf %4 : vector<16x32xf32> to vector<16x32xbf16>
    %6 = arith.truncf %1 : vector<16x32xf32> to vector<16x32xbf16>
    %c0_5 = arith.constant 0 : index
    %c0_6 = arith.constant 0 : index
    %c0_7 = arith.constant 0 : index
    %7 = vector.load %arg3[%c0_5, %c0_6, %c0_7] : memref<4x32x8xbf16, #tpu.memory_space<vmem>>, vector<1x32x8xbf16>
    %8 = vector.shape_cast %7 : vector<1x32x8xbf16> to vector<32x8xbf16>
    %cst = arith.constant dense<0.000000e+00> : vector<16x8xf32>
    %9 = tpu.matmul %5, %8, %cst {dimension_numbers = #tpu.dot_dimension_numbers<[1], [0], [0], [1], [0, 0, 1, 1], [], []>} : vector<16x32xbf16>, vector<32x8xbf16>, vector<16x8xf32> -> vector<16x8xf32>
    %c0_8 = arith.constant 0 : index
    %c0_9 = arith.constant 0 : index
    %c0_10 = arith.constant 0 : index
    %10 = vector.load %arg4[%c0_8, %c0_9, %c0_10] : memref<4x1x8xf32, #tpu.memory_space<vmem>>, vector<1x1x8xf32>
    %11 = vector.shape_cast %10 : vector<1x1x8xf32> to vector<1x8xf32>
    %12 = vector.broadcast %11 : vector<1x8xf32> to vector<16x8xf32>
    %13 = arith.addf %9, %12 : vector<16x8xf32>
    %c0_11 = arith.constant 0 : index
    %c0_12 = arith.constant 0 : index
    %c0_13 = arith.constant 0 : index
    %14 = vector.load %arg5[%c0_11, %c0_12, %c0_13] : memref<4x32x8xbf16, #tpu.memory_space<vmem>>, vector<1x32x8xbf16>
    %15 = vector.shape_cast %14 : vector<1x32x8xbf16> to vector<32x8xbf16>
    %cst_14 = arith.constant dense<0.000000e+00> : vector<16x8xf32>
    %16 = tpu.matmul %5, %15, %cst_14 {dimension_numbers = #tpu.dot_dimension_numbers<[1], [0], [0], [1], [0, 0, 1, 1], [], []>} : vector<16x32xbf16>, vector<32x8xbf16>, vector<16x8xf32> -> vector<16x8xf32>
    %c0_15 = arith.constant 0 : index
    %c0_16 = arith.constant 0 : index
    %c0_17 = arith.constant 0 : index
    %17 = vector.load %arg6[%c0_15, %c0_16, %c0_17] : memref<4x1x8xf32, #tpu.memory_space<vmem>>, vector<1x1x8xf32>
    %18 = vector.shape_cast %17 : vector<1x1x8xf32> to vector<1x8xf32>
    %19 = vector.broadcast %18 : vector<1x8xf32> to vector<16x8xf32>
    %20 = arith.addf %16, %19 : vector<16x8xf32>
    %c0_18 = arith.constant 0 : index
    %c0_19 = arith.constant 0 : index
    %c0_20 = arith.constant 0 : index
    %21 = vector.load %arg7[%c0_18, %c0_19, %c0_20] : memref<4x32x8xbf16, #tpu.memory_space<vmem>>, vector<1x32x8xbf16>
    %22 = vector.shape_cast %21 : vector<1x32x8xbf16> to vector<32x8xbf16>
    %cst_21 = arith.constant dense<0.000000e+00> : vector<16x8xf32>
    %23 = tpu.matmul %6, %22, %cst_21 {dimension_numbers = #tpu.dot_dimension_numbers<[1], [0], [0], [1], [0, 0, 1, 1], [], []>} : vector<16x32xbf16>, vector<32x8xbf16>, vector<16x8xf32> -> vector<16x8xf32>
    %c0_22 = arith.constant 0 : index
    %c0_23 = arith.constant 0 : index
    %c0_24 = arith.constant 0 : index
    %24 = vector.load %arg8[%c0_22, %c0_23, %c0_24] : memref<4x1x8xf32, #tpu.memory_space<vmem>>, vector<1x1x8xf32>
    %25 = vector.shape_cast %24 : vector<1x1x8xf32> to vector<1x8xf32>
    %26 = vector.broadcast %25 : vector<1x8xf32> to vector<16x8xf32>
    %27 = arith.addf %23, %26 : vector<16x8xf32>
    %cst_25 = arith.constant 0.353553385 : f32
    %28 = vector.broadcast %cst_25 : f32 to vector<16x8xf32>
    %29 = arith.mulf %13, %28 : vector<16x8xf32>
    %30 = arith.truncf %29 : vector<16x8xf32> to vector<16x8xbf16>
    %c0_26 = arith.constant 0 : index
    %c0_27 = arith.constant 0 : index
    %c0_28 = arith.constant 0 : index
    %31 = vector.load %arg14[%c0_26, %c0_27, %c0_28] : memref<4x16x8xbf16, #tpu.memory_space<vmem>>, vector<1x16x8xbf16>
    %32 = vector.shape_cast %31 : vector<1x16x8xbf16> to vector<16x8xbf16>
    %33 = vector.shape_cast %30 : vector<16x8xbf16> to vector<1x16x8xbf16>
    tpu.vector_store %arg14[%c0_26, %c0_27, %c0_28], %33 {strides = array<i32>} : memref<4x16x8xbf16, #tpu.memory_space<vmem>>, vector<1x16x8xbf16>,
    %34 = arith.truncf %20 : vector<16x8xf32> to vector<16x8xbf16>
    %c0_29 = arith.constant 0 : index
    %c0_30 = arith.constant 0 : index
    %c0_31 = arith.constant 0 : index
    %35 = vector.load %arg15[%c0_29, %c0_30, %c0_31] : memref<4x16x8xbf16, #tpu.memory_space<vmem>>, vector<1x16x8xbf16>
    %36 = vector.shape_cast %35 : vector<1x16x8xbf16> to vector<16x8xbf16>
    %37 = vector.shape_cast %34 : vector<16x8xbf16> to vector<1x16x8xbf16>
    tpu.vector_store %arg15[%c0_29, %c0_30, %c0_31], %37 {strides = array<i32>} : memref<4x16x8xbf16, #tpu.memory_space<vmem>>, vector<1x16x8xbf16>,
    %38 = arith.truncf %27 : vector<16x8xf32> to vector<16x8xbf16>
    %c0_32 = arith.constant 0 : index
    %c0_33 = arith.constant 0 : index
    %c0_34 = arith.constant 0 : index
    %39 = vector.load %arg16[%c0_32, %c0_33, %c0_34] : memref<4x16x8xbf16, #tpu.memory_space<vmem>>, vector<1x16x8xbf16>
    %40 = vector.shape_cast %39 : vector<1x16x8xbf16> to vector<16x8xbf16>
    %41 = vector.shape_cast %38 : vector<16x8xbf16> to vector<1x16x8xbf16>
    tpu.vector_store %arg16[%c0_32, %c0_33, %c0_34], %41 {strides = array<i32>} : memref<4x16x8xbf16, #tpu.memory_space<vmem>>, vector<1x16x8xbf16>,
    %c1 = arith.constant 1 : index
    %c0_35 = arith.constant 0 : index
    %c0_36 = arith.constant 0 : index
    %42 = vector.load %arg3[%c1, %c0_35, %c0_36] : memref<4x32x8xbf16, #tpu.memory_space<vmem>>, vector<1x32x8xbf16>
    %43 = vector.shape_cast %42 : vector<1x32x8xbf16> to vector<32x8xbf16>
    %cst_37 = arith.constant dense<0.000000e+00> : vector<16x8xf32>
    %44 = tpu.matmul %5, %43, %cst_37 {dimension_numbers = #tpu.dot_dimension_numbers<[1], [0], [0], [1], [0, 0, 1, 1], [], []>} : vector<16x32xbf16>, vector<32x8xbf16>, vector<16x8xf32> -> vector<16x8xf32>
    %c1_38 = arith.constant 1 : index
    %c0_39 = arith.constant 0 : index
    %c0_40 = arith.constant 0 : index
    %45 = vector.load %arg4[%c1_38, %c0_39, %c0_40] : memref<4x1x8xf32, #tpu.memory_space<vmem>>, vector<1x1x8xf32>
    %46 = vector.shape_cast %45 : vector<1x1x8xf32> to vector<1x8xf32>
    %47 = vector.broadcast %46 : vector<1x8xf32> to vector<16x8xf32>
    %48 = arith.addf %44, %47 : vector<16x8xf32>
    %c1_41 = arith.constant 1 : index
    %c0_42 = arith.constant 0 : index
    %c0_43 = arith.constant 0 : index
    %49 = vector.load %arg5[%c1_41, %c0_42, %c0_43] : memref<4x32x8xbf16, #tpu.memory_space<vmem>>, vector<1x32x8xbf16>
    %50 = vector.shape_cast %49 : vector<1x32x8xbf16> to vector<32x8xbf16>
    %cst_44 = arith.constant dense<0.000000e+00> : vector<16x8xf32>
    %51 = tpu.matmul %5, %50, %cst_44 {dimension_numbers = #tpu.dot_dimension_numbers<[1], [0], [0], [1], [0, 0, 1, 1], [], []>} : vector<16x32xbf16>, vector<32x8xbf16>, vector<16x8xf32> -> vector<16x8xf32>
    %c1_45 = arith.constant 1 : index
    %c0_46 = arith.constant 0 : index
    %c0_47 = arith.constant 0 : index
    %52 = vector.load %arg6[%c1_45, %c0_46, %c0_47] : memref<4x1x8xf32, #tpu.memory_space<vmem>>, vector<1x1x8xf32>
    %53 = vector.shape_cast %52 : vector<1x1x8xf32> to vector<1x8xf32>
    %54 = vector.broadcast %53 : vector<1x8xf32> to vector<16x8xf32>
    %55 = arith.addf %51, %54 : vector<16x8xf32>
    %c1_48 = arith.constant 1 : index
    %c0_49 = arith.constant 0 : index
    %c0_50 = arith.constant 0 : index
    %56 = vector.load %arg7[%c1_48, %c0_49, %c0_50] : memref<4x32x8xbf16, #tpu.memory_space<vmem>>, vector<1x32x8xbf16>
    %57 = vector.shape_cast %56 : vector<1x32x8xbf16> to vector<32x8xbf16>
    %cst_51 = arith.constant dense<0.000000e+00> : vector<16x8xf32>
    %58 = tpu.matmul %6, %57, %cst_51 {dimension_numbers = #tpu.dot_dimension_numbers<[1], [0], [0], [1], [0, 0, 1, 1], [], []>} : vector<16x32xbf16>, vector<32x8xbf16>, vector<16x8xf32> -> vector<16x8xf32>
    %c1_52 = arith.constant 1 : index
    %c0_53 = arith.constant 0 : index
    %c0_54 = arith.constant 0 : index
    %59 = vector.load %arg8[%c1_52, %c0_53, %c0_54] : memref<4x1x8xf32, #tpu.memory_space<vmem>>, vector<1x1x8xf32>
    %60 = vector.shape_cast %59 : vector<1x1x8xf32> to vector<1x8xf32>
    %61 = vector.broadcast %60 : vector<1x8xf32> to vector<16x8xf32>
    %62 = arith.addf %58, %61 : vector<16x8xf32>
    %cst_55 = arith.constant 0.353553385 : f32
    %63 = vector.broadcast %cst_55 : f32 to vector<16x8xf32>
    %64 = arith.mulf %48, %63 : vector<16x8xf32>
    %65 = arith.truncf %64 : vector<16x8xf32> to vector<16x8xbf16>
    %c1_56 = arith.constant 1 : index
    %c0_57 = arith.constant 0 : index
    %c0_58 = arith.constant 0 : index
    %66 = vector.load %arg14[%c1_56, %c0_57, %c0_58] : memref<4x16x8xbf16, #tpu.memory_space<vmem>>, vector<1x16x8xbf16>
    %67 = vector.shape_cast %66 : vector<1x16x8xbf16> to vector<16x8xbf16>
    %68 = vector.shape_cast %65 : vector<16x8xbf16> to vector<1x16x8xbf16>
    tpu.vector_store %arg14[%c1_56, %c0_57, %c0_58], %68 {strides = array<i32>} : memref<4x16x8xbf16, #tpu.memory_space<vmem>>, vector<1x16x8xbf16>,
    %69 = arith.truncf %55 : vector<16x8xf32> to vector<16x8xbf16>
    %c1_59 = arith.constant 1 : index
    %c0_60 = arith.constant 0 : index
    %c0_61 = arith.constant 0 : index
    %70 = vector.load %arg15[%c1_59, %c0_60, %c0_61] : memref<4x16x8xbf16, #tpu.memory_space<vmem>>, vector<1x16x8xbf16>
    %71 = vector.shape_cast %70 : vector<1x16x8xbf16> to vector<16x8xbf16>
    %72 = vector.shape_cast %69 : vector<16x8xbf16> to vector<1x16x8xbf16>
    tpu.vector_store %arg15[%c1_59, %c0_60, %c0_61], %72 {strides = array<i32>} : memref<4x16x8xbf16, #tpu.memory_space<vmem>>, vector<1x16x8xbf16>,
    %73 = arith.truncf %62 : vector<16x8xf32> to vector<16x8xbf16>
    %c1_62 = arith.constant 1 : index
    %c0_63 = arith.constant 0 : index
    %c0_64 = arith.constant 0 : index
    %74 = vector.load %arg16[%c1_62, %c0_63, %c0_64] : memref<4x16x8xbf16, #tpu.memory_space<vmem>>, vector<1x16x8xbf16>
    %75 = vector.shape_cast %74 : vector<1x16x8xbf16> to vector<16x8xbf16>
    %76 = vector.shape_cast %73 : vector<16x8xbf16> to vector<1x16x8xbf16>
    tpu.vector_store %arg16[%c1_62, %c0_63, %c0_64], %76 {strides = array<i32>} : memref<4x16x8xbf16, #tpu.memory_space<vmem>>, vector<1x16x8xbf16>,
    %c2 = arith.constant 2 : index
    %c0_65 = arith.constant 0 : index
    %c0_66 = arith.constant 0 : index
    %77 = vector.load %arg3[%c2, %c0_65, %c0_66] : memref<4x32x8xbf16, #tpu.memory_space<vmem>>, vector<1x32x8xbf16>
    %78 = vector.shape_cast %77 : vector<1x32x8xbf16> to vector<32x8xbf16>
    %cst_67 = arith.constant dense<0.000000e+00> : vector<16x8xf32>
    %79 = tpu.matmul %5, %78, %cst_67 {dimension_numbers = #tpu.dot_dimension_numbers<[1], [0], [0], [1], [0, 0, 1, 1], [], []>} : vector<16x32xbf16>, vector<32x8xbf16>, vector<16x8xf32> -> vector<16x8xf32>
    %c2_68 = arith.constant 2 : index
    %c0_69 = arith.constant 0 : index
    %c0_70 = arith.constant 0 : index
    %80 = vector.load %arg4[%c2_68, %c0_69, %c0_70] : memref<4x1x8xf32, #tpu.memory_space<vmem>>, vector<1x1x8xf32>
    %81 = vector.shape_cast %80 : vector<1x1x8xf32> to vector<1x8xf32>
    %82 = vector.broadcast %81 : vector<1x8xf32> to vector<16x8xf32>
    %83 = arith.addf %79, %82 : vector<16x8xf32>
    %c2_71 = arith.constant 2 : index
    %c0_72 = arith.constant 0 : index
    %c0_73 = arith.constant 0 : index
    %84 = vector.load %arg5[%c2_71, %c0_72, %c0_73] : memref<4x32x8xbf16, #tpu.memory_space<vmem>>, vector<1x32x8xbf16>
    %85 = vector.shape_cast %84 : vector<1x32x8xbf16> to vector<32x8xbf16>
    %cst_74 = arith.constant dense<0.000000e+00> : vector<16x8xf32>
    %86 = tpu.matmul %5, %85, %cst_74 {dimension_numbers = #tpu.dot_dimension_numbers<[1], [0], [0], [1], [0, 0, 1, 1], [], []>} : vector<16x32xbf16>, vector<32x8xbf16>, vector<16x8xf32> -> vector<16x8xf32>
    %c2_75 = arith.constant 2 : index
    %c0_76 = arith.constant 0 : index
    %c0_77 = arith.constant 0 : index
    %87 = vector.load %arg6[%c2_75, %c0_76, %c0_77] : memref<4x1x8xf32, #tpu.memory_space<vmem>>, vector<1x1x8xf32>
    %88 = vector.shape_cast %87 : vector<1x1x8xf32> to vector<1x8xf32>
    %89 = vector.broadcast %88 : vector<1x8xf32> to vector<16x8xf32>
    %90 = arith.addf %86, %89 : vector<16x8xf32>
    %c2_78 = arith.constant 2 : index
    %c0_79 = arith.constant 0 : index
    %c0_80 = arith.constant 0 : index
    %91 = vector.load %arg7[%c2_78, %c0_79, %c0_80] : memref<4x32x8xbf16, #tpu.memory_space<vmem>>, vector<1x32x8xbf16>
    %92 = vector.shape_cast %91 : vector<1x32x8xbf16> to vector<32x8xbf16>
    %cst_81 = arith.constant dense<0.000000e+00> : vector<16x8xf32>
    %93 = tpu.matmul %6, %92, %cst_81 {dimension_numbers = #tpu.dot_dimension_numbers<[1], [0], [0], [1], [0, 0, 1, 1], [], []>} : vector<16x32xbf16>, vector<32x8xbf16>, vector<16x8xf32> -> vector<16x8xf32>
    %c2_82 = arith.constant 2 : index
    %c0_83 = arith.constant 0 : index
    %c0_84 = arith.constant 0 : index
    %94 = vector.load %arg8[%c2_82, %c0_83, %c0_84] : memref<4x1x8xf32, #tpu.memory_space<vmem>>, vector<1x1x8xf32>
    %95 = vector.shape_cast %94 : vector<1x1x8xf32> to vector<1x8xf32>
    %96 = vector.broadcast %95 : vector<1x8xf32> to vector<16x8xf32>
    %97 = arith.addf %93, %96 : vector<16x8xf32>
    %cst_85 = arith.constant 0.353553385 : f32
    %98 = vector.broadcast %cst_85 : f32 to vector<16x8xf32>
    %99 = arith.mulf %83, %98 : vector<16x8xf32>
    %100 = arith.truncf %99 : vector<16x8xf32> to vector<16x8xbf16>
    %c2_86 = arith.constant 2 : index
    %c0_87 = arith.constant 0 : index
    %c0_88 = arith.constant 0 : index
    %101 = vector.load %arg14[%c2_86, %c0_87, %c0_88] : memref<4x16x8xbf16, #tpu.memory_space<vmem>>, vector<1x16x8xbf16>
    %102 = vector.shape_cast %101 : vector<1x16x8xbf16> to vector<16x8xbf16>
    %103 = vector.shape_cast %100 : vector<16x8xbf16> to vector<1x16x8xbf16>
    tpu.vector_store %arg14[%c2_86, %c0_87, %c0_88], %103 {strides = array<i32>} : memref<4x16x8xbf16, #tpu.memory_space<vmem>>, vector<1x16x8xbf16>,
    %104 = arith.truncf %90 : vector<16x8xf32> to vector<16x8xbf16>
    %c2_89 = arith.constant 2 : index
    %c0_90 = arith.constant 0 : index
    %c0_91 = arith.constant 0 : index
    %105 = vector.load %arg15[%c2_89, %c0_90, %c0_91] : memref<4x16x8xbf16, #tpu.memory_space<vmem>>, vector<1x16x8xbf16>
    %106 = vector.shape_cast %105 : vector<1x16x8xbf16> to vector<16x8xbf16>
    %107 = vector.shape_cast %104 : vector<16x8xbf16> to vector<1x16x8xbf16>
    tpu.vector_store %arg15[%c2_89, %c0_90, %c0_91], %107 {strides = array<i32>} : memref<4x16x8xbf16, #tpu.memory_space<vmem>>, vector<1x16x8xbf16>,
    %108 = arith.truncf %97 : vector<16x8xf32> to vector<16x8xbf16>
    %c2_92 = arith.constant 2 : index
    %c0_93 = arith.constant 0 : index
    %c0_94 = arith.constant 0 : index
    %109 = vector.load %arg16[%c2_92, %c0_93, %c0_94] : memref<4x16x8xbf16, #tpu.memory_space<vmem>>, vector<1x16x8xbf16>
    %110 = vector.shape_cast %109 : vector<1x16x8xbf16> to vector<16x8xbf16>
    %111 = vector.shape_cast %108 : vector<16x8xbf16> to vector<1x16x8xbf16>
    tpu.vector_store %arg16[%c2_92, %c0_93, %c0_94], %111 {strides = array<i32>} : memref<4x16x8xbf16, #tpu.memory_space<vmem>>, vector<1x16x8xbf16>,
    %c3 = arith.constant 3 : index
    %c0_95 = arith.constant 0 : index
    %c0_96 = arith.constant 0 : index
    %112 = vector.load %arg3[%c3, %c0_95, %c0_96] : memref<4x32x8xbf16, #tpu.memory_space<vmem>>, vector<1x32x8xbf16>
    %113 = vector.shape_cast %112 : vector<1x32x8xbf16> to vector<32x8xbf16>
    %cst_97 = arith.constant dense<0.000000e+00> : vector<16x8xf32>
    %114 = tpu.matmul %5, %113, %cst_97 {dimension_numbers = #tpu.dot_dimension_numbers<[1], [0], [0], [1], [0, 0, 1, 1], [], []>} : vector<16x32xbf16>, vector<32x8xbf16>, vector<16x8xf32> -> vector<16x8xf32>
    %c3_98 = arith.constant 3 : index
    %c0_99 = arith.constant 0 : index
    %c0_100 = arith.constant 0 : index
    %115 = vector.load %arg4[%c3_98, %c0_99, %c0_100] : memref<4x1x8xf32, #tpu.memory_space<vmem>>, vector<1x1x8xf32>
    %116 = vector.shape_cast %115 : vector<1x1x8xf32> to vector<1x8xf32>
    %117 = vector.broadcast %116 : vector<1x8xf32> to vector<16x8xf32>
    %118 = arith.addf %114, %117 : vector<16x8xf32>
    %c3_101 = arith.constant 3 : index
    %c0_102 = arith.constant 0 : index
    %c0_103 = arith.constant 0 : index
    %119 = vector.load %arg5[%c3_101, %c0_102, %c0_103] : memref<4x32x8xbf16, #tpu.memory_space<vmem>>, vector<1x32x8xbf16>
    %120 = vector.shape_cast %119 : vector<1x32x8xbf16> to vector<32x8xbf16>
    %cst_104 = arith.constant dense<0.000000e+00> : vector<16x8xf32>
    %121 = tpu.matmul %5, %120, %cst_104 {dimension_numbers = #tpu.dot_dimension_numbers<[1], [0], [0], [1], [0, 0, 1, 1], [], []>} : vector<16x32xbf16>, vector<32x8xbf16>, vector<16x8xf32> -> vector<16x8xf32>
    %c3_105 = arith.constant 3 : index
    %c0_106 = arith.constant 0 : index
    %c0_107 = arith.constant 0 : index
    %122 = vector.load %arg6[%c3_105, %c0_106, %c0_107] : memref<4x1x8xf32, #tpu.memory_space<vmem>>, vector<1x1x8xf32>
    %123 = vector.shape_cast %122 : vector<1x1x8xf32> to vector<1x8xf32>
    %124 = vector.broadcast %123 : vector<1x8xf32> to vector<16x8xf32>
    %125 = arith.addf %121, %124 : vector<16x8xf32>
    %c3_108 = arith.constant 3 : index
    %c0_109 = arith.constant 0 : index
    %c0_110 = arith.constant 0 : index
    %126 = vector.load %arg7[%c3_108, %c0_109, %c0_110] : memref<4x32x8xbf16, #tpu.memory_space<vmem>>, vector<1x32x8xbf16>
    %127 = vector.shape_cast %126 : vector<1x32x8xbf16> to vector<32x8xbf16>
    %cst_111 = arith.constant dense<0.000000e+00> : vector<16x8xf32>
    %128 = tpu.matmul %6, %127, %cst_111 {dimension_numbers = #tpu.dot_dimension_numbers<[1], [0], [0], [1], [0, 0, 1, 1], [], []>} : vector<16x32xbf16>, vector<32x8xbf16>, vector<16x8xf32> -> vector<16x8xf32>
    %c3_112 = arith.constant 3 : index
    %c0_113 = arith.constant 0 : index
    %c0_114 = arith.constant 0 : index
    %129 = vector.load %arg8[%c3_112, %c0_113, %c0_114] : memref<4x1x8xf32, #tpu.memory_space<vmem>>, vector<1x1x8xf32>
    %130 = vector.shape_cast %129 : vector<1x1x8xf32> to vector<1x8xf32>
    %131 = vector.broadcast %130 : vector<1x8xf32> to vector<16x8xf32>
    %132 = arith.addf %128, %131 : vector<16x8xf32>
    %cst_115 = arith.constant 0.353553385 : f32
    %133 = vector.broadcast %cst_115 : f32 to vector<16x8xf32>
    %134 = arith.mulf %118, %133 : vector<16x8xf32>
    %135 = arith.truncf %134 : vector<16x8xf32> to vector<16x8xbf16>
    %c3_116 = arith.constant 3 : index
    %c0_117 = arith.constant 0 : index
    %c0_118 = arith.constant 0 : index
    %136 = vector.load %arg14[%c3_116, %c0_117, %c0_118] : memref<4x16x8xbf16, #tpu.memory_space<vmem>>, vector<1x16x8xbf16>
    %137 = vector.shape_cast %136 : vector<1x16x8xbf16> to vector<16x8xbf16>
    %138 = vector.shape_cast %135 : vector<16x8xbf16> to vector<1x16x8xbf16>
    tpu.vector_store %arg14[%c3_116, %c0_117, %c0_118], %138 {strides = array<i32>} : memref<4x16x8xbf16, #tpu.memory_space<vmem>>, vector<1x16x8xbf16>,
    %139 = arith.truncf %125 : vector<16x8xf32> to vector<16x8xbf16>
    %c3_119 = arith.constant 3 : index
    %c0_120 = arith.constant 0 : index
    %c0_121 = arith.constant 0 : index
    %140 = vector.load %arg15[%c3_119, %c0_120, %c0_121] : memref<4x16x8xbf16, #tpu.memory_space<vmem>>, vector<1x16x8xbf16>
    %141 = vector.shape_cast %140 : vector<1x16x8xbf16> to vector<16x8xbf16>
    %142 = vector.shape_cast %139 : vector<16x8xbf16> to vector<1x16x8xbf16>
    tpu.vector_store %arg15[%c3_119, %c0_120, %c0_121], %142 {strides = array<i32>} : memref<4x16x8xbf16, #tpu.memory_space<vmem>>, vector<1x16x8xbf16>,
    %143 = arith.truncf %132 : vector<16x8xf32> to vector<16x8xbf16>
    %c3_122 = arith.constant 3 : index
    %c0_123 = arith.constant 0 : index
    %c0_124 = arith.constant 0 : index
    %144 = vector.load %arg16[%c3_122, %c0_123, %c0_124] : memref<4x16x8xbf16, #tpu.memory_space<vmem>>, vector<1x16x8xbf16>
    %145 = vector.shape_cast %144 : vector<1x16x8xbf16> to vector<16x8xbf16>
    %146 = vector.shape_cast %143 : vector<16x8xbf16> to vector<1x16x8xbf16>
    tpu.vector_store %arg16[%c3_122, %c0_123, %c0_124], %146 {strides = array<i32>} : memref<4x16x8xbf16, #tpu.memory_space<vmem>>, vector<1x16x8xbf16>,
    %c0_125 = arith.constant 0 : index
    %c0_126 = arith.constant 0 : index
    %c0_127 = arith.constant 0 : index
    %147 = vector.load %arg15[%c0_125, %c0_126, %c0_127] : memref<4x16x8xbf16, #tpu.memory_space<vmem>>, vector<4x16x8xbf16>
    %c0_128 = arith.constant 0 : index
    %c0_129 = arith.constant 0 : index
    %c0_130 = arith.constant 0 : index
    %148 = vector.load %arg16[%c0_128, %c0_129, %c0_130] : memref<4x16x8xbf16, #tpu.memory_space<vmem>>, vector<4x16x8xbf16>
    %c0_131 = arith.constant 0 : index
    %c0_132 = arith.constant 0 : index
    %c0_133 = arith.constant 0 : index
    %149 = vector.load %arg14[%c0_131, %c0_132, %c0_133] : memref<4x16x8xbf16, #tpu.memory_space<vmem>>, vector<4x16x8xbf16>
    "tpu.trace_start"() <{level = 10 : i32, message = "hqd,hkd->hqk"}> : () -> ()
    %cst_134 = arith.constant dense<0.000000e+00> : vector<4x16x16xf32>
    %150 = tpu.matmul %149, %147, %cst_134 {dimension_numbers = #tpu.dot_dimension_numbers<[2], [2], [1], [1], [0, 0, 0, 1, 1, 1], [0], [0]>} : vector<4x16x8xbf16>, vector<4x16x8xbf16>, vector<4x16x16xf32> -> vector<4x16x16xf32>
    "tpu.trace_stop"() : () -> ()
    %cst_135 = arith.constant dense<0xFF800000> : vector<4x16xf32>
    %151 = vector.multi_reduction <maximumf>, %150, %cst_135 [2] : vector<4x16x16xf32> to vector<4x16xf32>
    %152 = vector.shape_cast %151 : vector<4x16xf32> to vector<4x16x1xf32>
    %153 = vector.broadcast %152 : vector<4x16x1xf32> to vector<4x16x16xf32>
    %154 = arith.subf %150, %153 : vector<4x16x16xf32>
    %155 = math.exp %154 : vector<4x16x16xf32>
    %cst_136 = arith.constant dense<0.000000e+00> : vector<4x16xf32>
    %156 = vector.multi_reduction <add>, %155, %cst_136 [2] : vector<4x16x16xf32> to vector<4x16xf32>
    %157 = vector.shape_cast %156 : vector<4x16xf32> to vector<4x16x1xf32>
    %158 = tpu.reciprocal %157 {approx = true} : vector<4x16x1xf32> -> vector<4x16x1xf32>
    %159 = vector.broadcast %158 : vector<4x16x1xf32> to vector<4x16x16xf32>
    %160 = arith.mulf %155, %159 : vector<4x16x16xf32>
    %161 = arith.truncf %160 : vector<4x16x16xf32> to vector<4x16x16xbf16>
    "tpu.trace_start"() <{level = 10 : i32, message = "hqk,hkd->hqd"}> : () -> ()
    %cst_137 = arith.constant dense<0.000000e+00> : vector<4x16x8xf32>
    %162 = tpu.matmul %161, %148, %cst_137 {dimension_numbers = #tpu.dot_dimension_numbers<[2], [1], [1], [2], [0, 0, 0, 1, 1, 2], [0], [0]>} : vector<4x16x16xbf16>, vector<4x16x8xbf16>, vector<4x16x8xf32> -> vector<4x16x8xf32>
    "tpu.trace_stop"() : () -> ()
    %163 = arith.truncf %162 : vector<4x16x8xf32> to vector<4x16x8xbf16>
    %c0_138 = arith.constant 0 : index
    %c0_139 = arith.constant 0 : index
    %c0_140 = arith.constant 0 : index
    %164 = vector.load %arg9[%c0_138, %c0_139, %c0_140] : memref<4x8x32xbf16, #tpu.memory_space<vmem>>, vector<4x8x32xbf16>
    "tpu.trace_start"() <{level = 10 : i32, message = "hqd,hde->hqe"}> : () -> ()
    %cst_141 = arith.constant dense<0.000000e+00> : vector<4x16x32xf32>
    %165 = tpu.matmul %163, %164, %cst_141 {dimension_numbers = #tpu.dot_dimension_numbers<[2], [1], [1], [2], [0, 0, 0, 1, 1, 2], [0], [0]>} : vector<4x16x8xbf16>, vector<4x8x32xbf16>, vector<4x16x32xf32> -> vector<4x16x32xf32>
    "tpu.trace_stop"() : () -> ()
    %cst_142 = arith.constant dense<0.000000e+00> : vector<16x32xf32>
    %166 = vector.multi_reduction <add>, %165, %cst_142 [0] : vector<4x16x32xf32> to vector<16x32xf32>
    %c0_143 = arith.constant 0 : index
    %c0_144 = arith.constant 0 : index
    %167 = vector.load %arg10[%c0_143, %c0_144] : memref<1x32xf32, #tpu.memory_space<vmem>>, vector<1x32xf32>
    %168 = vector.broadcast %167 : vector<1x32xf32> to vector<16x32xf32>
    %169 = arith.addf %166, %168 : vector<16x32xf32>
    %170 = arith.addf %1, %169 : vector<16x32xf32>
    %cst_145 = arith.constant dense<0.000000e+00> : vector<16xf32>
    %171 = vector.multi_reduction <add>, %170, %cst_145 [1] : vector<16x32xf32> to vector<16xf32>
    %172 = vector.shape_cast %171 : vector<16xf32> to vector<16x1xf32>
    %cst_146 = arith.constant 3.200000e+01 : f32
    %173 = vector.broadcast %cst_146 : f32 to vector<16x1xf32>
    %174 = arith.divf %172, %173 : vector<16x1xf32>
    %175 = vector.broadcast %174 : vector<16x1xf32> to vector<16x32xf32>
    %176 = arith.subf %170, %175 : vector<16x32xf32>
    %177 = arith.mulf %176, %176 : vector<16x32xf32>
    %cst_147 = arith.constant dense<0.000000e+00> : vector<16xf32>
    %178 = vector.multi_reduction <add>, %177, %cst_147 [1] : vector<16x32xf32> to vector<16xf32>
    %179 = vector.shape_cast %178 : vector<16xf32> to vector<16x1xf32>
    %cst_148 = arith.constant 3.200000e+01 : f32
    %180 = vector.broadcast %cst_148 : f32 to vector<16x1xf32>
    %181 = arith.divf %179, %180 : vector<16x1xf32>
    %182 = vector.broadcast %174 : vector<16x1xf32> to vector<16x32xf32>
    %183 = arith.subf %170, %182 : vector<16x32xf32>
    %cst_149 = arith.constant 9.99999974E-6 : f32
    %184 = vector.broadcast %cst_149 : f32 to vector<16x1xf32>
    %185 = arith.addf %181, %184 : vector<16x1xf32>
    %186 = math.rsqrt %185 : vector<16x1xf32>
    %187 = vector.broadcast %186 : vector<16x1xf32> to vector<16x32xf32>
    %188 = arith.mulf %183, %187 : vector<16x32xf32>
    %c0_150 = arith.constant 0 : index
    %c0_151 = arith.constant 0 : index
    %189 = vector.load %arg11[%c0_150, %c0_151] : memref<1x32xf32, #tpu.memory_space<vmem>>, vector<1x32xf32>
    %190 = vector.broadcast %189 : vector<1x32xf32> to vector<16x32xf32>
    %191 = arith.mulf %188, %190 : vector<16x32xf32>
    %c0_152 = arith.constant 0 : index
    %c0_153 = arith.constant 0 : index
    %192 = vector.load %arg12[%c0_152, %c0_153] : memref<1x32xf32, #tpu.memory_space<vmem>>, vector<1x32xf32>
    %193 = vector.broadcast %192 : vector<1x32xf32> to vector<16x32xf32>
    %194 = arith.addf %191, %193 : vector<16x32xf32>
    %c0_154 = arith.constant 0 : index
    %c0_155 = arith.constant 0 : index
    %c0_156 = arith.constant 0 : index
    %195 = vector.load %arg13[%c0_154, %c0_155, %c0_156] : memref<1x16x32xf32, #tpu.memory_space<vmem>>, vector<1x16x32xf32>
    %196 = vector.shape_cast %195 : vector<1x16x32xf32> to vector<16x32xf32>
    %197 = vector.shape_cast %194 : vector<16x32xf32> to vector<1x16x32xf32>
    tpu.vector_store %arg13[%c0_154, %c0_155, %c0_156], %197 {strides = array<i32>} : memref<1x16x32xf32, #tpu.memory_space<vmem>>, vector<1x16x32xf32>,
    return
  }
  func.func @transform_0(%arg0: i32) -> (i32, i32, i32) {
    %c0_i32 = arith.constant 0 : i32
    %c0_i32_0 = arith.constant 0 : i32
    %c0_i32_1 = arith.constant 0 : i32
    return %arg0, %c0_i32, %c0_i32_0 : i32, i32, i32
  }
  func.func @transform_1(%arg0: i32) -> (i32, i32, i32) {
    %c0_i32 = arith.constant 0 : i32
    %c0_i32_0 = arith.constant 0 : i32
    %c0_i32_1 = arith.constant 0 : i32
    return %arg0, %c0_i32, %c0_i32_0 : i32, i32, i32
  }
  func.func @transform_2(%arg0: i32) -> (i32, i32, i32) {
    %c0_i32 = arith.constant 0 : i32
    %c0_i32_0 = arith.constant 0 : i32
    %c0_i32_1 = arith.constant 0 : i32
    %c0_i32_2 = arith.constant 0 : i32
    return %c0_i32, %c0_i32_0, %c0_i32_1 : i32, i32, i32
  }
  func.func @transform_3(%arg0: i32) -> (i32, i32, i32) {
    %c0_i32 = arith.constant 0 : i32
    %c0_i32_0 = arith.constant 0 : i32
    %c0_i32_1 = arith.constant 0 : i32
    %c0_i32_2 = arith.constant 0 : i32
    return %c0_i32, %c0_i32_0, %c0_i32_1 : i32, i32, i32
  }
  func.func @transform_4(%arg0: i32) -> (i32, i32, i32) {
    %c0_i32 = arith.constant 0 : i32
    %c0_i32_0 = arith.constant 0 : i32
    %c0_i32_1 = arith.constant 0 : i32
    %c0_i32_2 = arith.constant 0 : i32
    return %c0_i32, %c0_i32_0, %c0_i32_1 : i32, i32, i32
  }
  func.func @transform_5(%arg0: i32) -> (i32, i32, i32) {
    %c0_i32 = arith.constant 0 : i32
    %c0_i32_0 = arith.constant 0 : i32
    %c0_i32_1 = arith.constant 0 : i32
    %c0_i32_2 = arith.constant 0 : i32
    return %c0_i32, %c0_i32_0, %c0_i32_1 : i32, i32, i32
  }
  func.func @transform_6(%arg0: i32) -> (i32, i32, i32) {
    %c0_i32 = arith.constant 0 : i32
    %c0_i32_0 = arith.constant 0 : i32
    %c0_i32_1 = arith.constant 0 : i32
    %c0_i32_2 = arith.constant 0 : i32
    return %c0_i32, %c0_i32_0, %c0_i32_1 : i32, i32, i32
  }
  func.func @transform_7(%arg0: i32) -> (i32, i32, i32) {
    %c0_i32 = arith.constant 0 : i32
    %c0_i32_0 = arith.constant 0 : i32
    %c0_i32_1 = arith.constant 0 : i32
    %c0_i32_2 = arith.constant 0 : i32
    return %c0_i32, %c0_i32_0, %c0_i32_1 : i32, i32, i32
  }
  func.func @transform_8(%arg0: i32) -> (i32, i32, i32) {
    %c0_i32 = arith.constant 0 : i32
    %c0_i32_0 = arith.constant 0 : i32
    %c0_i32_1 = arith.constant 0 : i32
    %c0_i32_2 = arith.constant 0 : i32
    return %c0_i32, %c0_i32_0, %c0_i32_1 : i32, i32, i32
  }
  func.func @transform_9(%arg0: i32) -> (i32, i32) {
    %c0_i32 = arith.constant 0 : i32
    %c0_i32_0 = arith.constant 0 : i32
    %c0_i32_1 = arith.constant 0 : i32
    return %c0_i32, %c0_i32_0 : i32, i32
  }
  func.func @transform_10(%arg0: i32) -> (i32, i32) {
    %c0_i32 = arith.constant 0 : i32
    %c0_i32_0 = arith.constant 0 : i32
    %c0_i32_1 = arith.constant 0 : i32
    return %c0_i32, %c0_i32_0 : i32, i32
  }
  func.func @transform_11(%arg0: i32) -> (i32, i32) {
    %c0_i32 = arith.constant 0 : i32
    %c0_i32_0 = arith.constant 0 : i32
    %c0_i32_1 = arith.constant 0 : i32
    return %c0_i32, %c0_i32_0 : i32, i32
  }
  func.func @transform_12(%arg0: i32) -> (i32, i32, i32) {
    %c0_i32 = arith.constant 0 : i32
    %c0_i32_0 = arith.constant 0 : i32
    %c0_i32_1 = arith.constant 0 : i32
    return %arg0, %c0_i32, %c0_i32_0 : i32, i32, i32
  }
}

</mosaic_0001>

<bundles_post_ra>
// kernel: transformer_encoder_forward.7
= control target key start
LH: loop header
LB: loop body
LE: loop exit
PB: predicated region body
PF: predicated region fallthrough
CT: control target
= control target key end

     0   :  { %vm62_vm0 = vcmask 261120   ;;  %vm163_vm1 = vcmask 523264   ;;  %s580_s1 = inlined_call_operand.vmem [shape: bf16[32,64], index: 1, kind: input, shape index: {}]   ;;  %s581_s0 = inlined_call_operand.vmem [shape: f32[32,32], index: 0, kind: input, shape index: {}]   ;;  %s582_s3 = inlined_call_operand.vmem [shape: bf16[64,32], index: 3, kind: input, shape index: {}]   ;;  %s583_s2 = inlined_call_operand.vmem [shape: f32[1,64], index: 2, kind: input, shape index: {}]   ;;  %s584_s4 = inlined_call_operand.vmem [shape: f32[1,32], index: 4, kind: input, shape index: {}]   ;;  %s585_s5 = inlined_call_operand.vmem [shape: f32[1,32], index: 5, kind: input, shape index: {}]   ;;  %s586_s6 = inlined_call_operand.vmem [shape: f32[1,32], index: 6, kind: input, shape index: {}]   ;;  %s587_s7 = inlined_call_operand.vmem [shape: f32[1,32], index: 7, kind: input, shape index: {}]   ;;  %s588_s8 = inlined_call_operand.vmem [shape: f32[1,32], index: 8, kind: input, shape index: {}]   ;;  %s589_s9 = inlined_call_operand.vmem [shape: f32[32,32], index: 9, kind: output, shape index: {}]  }
   0x1   :  { %v426_v0 = vld [vmem:[%s580_s1 + $0x8] sm:$0xff]   ;;  %v427_v1 = vld [vmem:[%s580_s1] sm:$0xff]   ;;  %v35_v4 = vld [vmem:[%s581_s0 + $0x10] sm:$0xff] }
   0x2   :  { %406 = vmatprep.subr.bf16.mxu0 %v426_v0  ;;  %v33_v2 = vld [vmem:[%s581_s0] sm:$0xff]  ;;  %v34_v3 = vld [vmem:[%s581_s0 + $0x8] sm:$0xff]  ;;  %v36_v6 = vld [vmem:[%s581_s0 + $0x18] sm:$0xff] }
   0x3   :  { %407 = vmatpush3.bf16.msra.mxu0 %v426_v0  ;;  %v37_v5 = vpack.c.bf16 %v34_v3, %v33_v2  ;;  %v428_v7 = vld [vmem:[%s582_s3 + $0x18] sm:$0xff]   ;;  %v38_v8 = vpack.c.bf16 %v36_v6, %v35_v4  ;;  %v429_v9 = vld [vmem:[%s582_s3 + $0x10] sm:$0xff]   ;;  %v430_v10 = vld [vmem:[%s582_s3 + $0x8] sm:$0xff]  }
   0x4   :  { %408 = vmatprep.subr.bf16.mxu0 %v427_v1  ;;  %414 = vmatprep.subr.bf16.mxu1 %v428_v7  ;;  %v431_v11 = vld [vmem:[%s582_s3] sm:$0xff]  }
   0x5   :  { %410 = vmatprep.mubr.msk.bf16.mxu0 %vm62_vm0, %v37_v5  ;;  %415 = vmatpush3.bf16.msra.mxu1 %v428_v7  ;;  %v380_v14 = vld [vmem:[%s583_s2] ss:$0 sm:$0xff] }
   0x6   :  { %416 = vmatprep.subr.bf16.mxu1 %v429_v9  ;;  %v385_v27 = vld [vmem:[%s584_s4] ss:$0 sm:$0xff] }
   0x7   :  { %409 = vmatpush3.bf16.msra.mxu0 %v427_v1 }
   0x9   :  { %417 = vmatpush3.bf16.msra.mxu1 %v429_v9 }
   0xa   :  { %411 = vmatmul.mubr.msk.bf16.vlgmr.msra.gmra.mxu0 %vm62_vm0, %v38_v8  ;;  %418 = vmatprep.subr.bf16.mxu1 %v430_v10 }
   0xd   :  { %419 = vmatpush3.bf16.msra.mxu1 %v430_v10 }
   0xe   :  { %420 = vmatprep.subr.bf16.mxu1 %v431_v11 }
  0x11   :  { %421 = vmatpush3.bf16.msra.mxu1 %v431_v11 }
  0xca   :  { %v412_v12 = vpop.f32.mrf.mxu0 }
  0xcb   :  { %v112_v18 = vadd.f32 %v412_v12, %v380_v14 }
  0xcc   :  { %v103_v13 = vpop.f32.mrf.mxu0 }
  0xcd   :  { %v104_v16 = vadd.f32 %v380_v14, %v103_v13  ;;  %v120_v24 = vmax.f32 %v112_v18, 0.0  ;;  %v392_v13 = vld [vmem:[%s585_s5] ss:$0 sm:$0xff] }
  0xce   :  { %v413_v15 = vpop.f32.mrf.mxu0 }
  0xcf   :  { %v115_v17 = vadd.f32 %v413_v15, %v380_v14  ;;  %v118_v22 = vmax.f32 %v104_v16, 0.0  ;;  %v393_v15 = vld [vmem:[%s586_s6] ss:$0 sm:$0xff] }
  0xd0   :  { %v106_v19 = vpop.f32.mrf.mxu0 }
  0xd1   :  { %v107_v20 = vadd.f32 %v380_v14, %v106_v19  ;;  %v121_v21 = vmax.f32 %v115_v17, 0.0 }
  0xd3   :  { %v119_v23 = vmax.f32 %v107_v20, 0.0  ;;  %v123_v26 = vpack.c.bf16 %v121_v21, %v120_v24 }
  0xd5   :  { %v122_v25 = vpack.c.bf16 %v119_v23, %v118_v22 }
  0xd7   :  { %422 = vmatprep.mubr.msk.bf16.mxu1 %vm163_vm1, %v122_v25 }
  0xd8   :  { %423 = vmatmul.mubr.msk.bf16.vlgmr.msra.gmra.mxu1 %vm163_vm1, %v123_v26 }
 0x198   :  { %v424_v28 = vpop.f32.mrf.mxu1 }
 0x199   :  { %v213_v29 = vadd.f32 %v424_v28, %v385_v27 }
 0x19a   :  { %v204_v30 = vpop.f32.mrf.mxu1 }
 0x19b   :  { %v205_v31 = vadd.f32 %v385_v27, %v204_v30  ;;  %v221_v32 = vadd.f32 %v213_v29, %v35_v4 }
 0x19c   :  { %v425_v33 = vpop.f32.mrf.mxu1 }
 0x19d   :  { %v216_v34 = vadd.f32 %v425_v33, %v385_v27  ;;  %v229_v35 = vsel %vm62_vm0, %v221_v32, 0.0  ;;  %v219_v36 = vadd.f32 %v205_v31, %v33_v2 }
 0x19e   :  { %230 = vadd.xlane.f32.xlu1 %v229_v35  ;;  %v207_v37 = vpop.f32.mrf.mxu1 }
 0x19f   :  { %v208_v38 = vadd.f32 %v385_v27, %v207_v37  ;;  %v223_v39 = vsel %vm62_vm0, %v219_v36, 0.0  ;;  %v222_v40 = vadd.f32 %v216_v34, %v36_v6 }
 0x1a0   :  { %224 = vadd.xlane.f32.xlu0 %v223_v39 }
 0x1a1   :  { %v232_v41 = vsel %vm62_vm0, %v222_v40, 0.0  ;;  %v220_v42 = vadd.f32 %v208_v38, %v34_v3 }
 0x1a2   :  { %233 = vadd.xlane.f32.xlu1 %v232_v41 }
 0x1a3   :  { %v226_v43 = vsel %vm62_vm0, %v220_v42, 0.0 }
 0x1a4   :  { %227 = vadd.xlane.f32.xlu0 %v226_v43 }
 0x227   :  { %v231_v44 = vpop.xlane.xlu1 %230 }
 0x228   :  { %v238_v45 = vmul.f32 0.03125, %v231_v44 }
 0x229   :  { %v225_v46 = vpop.xlane.xlu0 %224 }
 0x22a   :  { %v236_v47 = vmul.f32 0.03125, %v225_v46  ;;  %v242_v49 = vsub.f32 %v221_v32, %v238_v45 }
 0x22b   :  { %v234_v48 = vpop.xlane.xlu1 %233 }
 0x22c   :  { %v240_v50 = vsub.f32 %v219_v36, %v236_v47  ;;  %v239_v51 = vmul.f32 0.03125, %v234_v48  ;;  %v246_v58 = vmul.f32 %v242_v49, %v242_v49 }
 0x22d   :  { %v228_v52 = vpop.xlane.xlu0 %227 }
 0x22e   :  { %v237_v53 = vmul.f32 0.03125, %v228_v52  ;;  %v244_v54 = vmul.f32 %v240_v50, %v240_v50  ;;  %v243_v55 = vsub.f32 %v222_v40, %v239_v51  ;;  %v254_v60 = vsel %vm62_vm0, %v246_v58, 0.0 }
 0x230   :  { %v241_v56 = vsub.f32 %v220_v42, %v237_v53  ;;  %v248_v57 = vsel %vm62_vm0, %v244_v54, 0.0  ;;  %v247_v62 = vmul.f32 %v243_v55, %v243_v55 }
 0x231   :  { %249 = vadd.xlane.f32.xlu0 %v248_v57 }
 0x232   :  { %v245_v59 = vmul.f32 %v241_v56, %v241_v56  ;;  %v257_v63 = vsel %vm62_vm0, %v247_v62, 0.0 }
 0x234   :  { %v251_v61 = vsel %vm62_vm0, %v245_v59, 0.0 }
 0x235   :  { %255 = vadd.xlane.f32.xlu0 %v254_v60  ;;  %252 = vadd.xlane.f32.xlu1 %v251_v61 }
 0x239   :  { %258 = vadd.xlane.f32.xlu1 %v257_v63 }
 0x2ba   :  { %v250_v0 = vpop.xlane.xlu0 %249 }
 0x2bb   :  { %v260_v1 = vmul.f32 0.03125, %v250_v0 }
 0x2bd   :  { %v264_v2 = vadd.f32 1e-05, %v260_v1 }
 0x2be   :  { %v253_v3 = vpop.xlane.xlu1 %252  ;;  %v256_v4 = vpop.xlane.xlu0 %255 }
 0x2bf   :  { %432 = vrsqrt.f32 %v264_v2  ;;  %v261_v5 = vmul.f32 0.03125, %v253_v3  ;;  %v262_v6 = vmul.f32 0.03125, %v256_v4  ;;  %v394_v3 = vld [vmem:[%s587_s7] ss:$0 sm:$0xff] }
 0x2c1   :  { %v265_v7 = vadd.f32 1e-05, %v261_v5  ;;  %v266_v8 = vadd.f32 1e-05, %v262_v6  ;;  %v395_v5 = vld [vmem:[%s588_s8] ss:$0 sm:$0xff] }
 0x2c2   :  { %v259_v9 = vpop.xlane.xlu1 %258 }
 0x2c3   :  { %434 = vrsqrt.f32 %v265_v7  ;;  %v263_v10 = vmul.f32 0.03125, %v259_v9 }
 0x2c4   :  { %436 = vrsqrt.f32 %v266_v8 }
 0x2c5   :  { %v267_v11 = vadd.f32 1e-05, %v263_v10 }
 0x2c7   :  { %438 = vrsqrt.f32 %v267_v11 }
 0x2cc   :  { %v433_v12 = vpop.eup %432 }
 0x2cd   :  { %v272_v14 = vmul.f32 %v433_v12, %v240_v50 }
 0x2cf   :  { %v283_v16 = vmul.f32 %v392_v13, %v272_v14 }
 0x2d0   :  { %v435_v17 = vpop.eup %434 }
 0x2d1   :  { %v437_v18 = vpop.eup %436  ;;  %v294_v19 = vadd.f32 %v393_v15, %v283_v16  ;;  %v273_v20 = vmul.f32 %v435_v17, %v241_v56 }
 0x2d2   :  { %v274_v21 = vmul.f32 %v437_v18, %v242_v49 }
 0x2d3   :  { %v298_v22 = vsel %vm62_vm0, %v294_v19, 0.0  ;;  %v284_v23 = vmul.f32 %v392_v13, %v273_v20 }
 0x2d4   :  { %v439_v24 = vpop.eup %438  ;;  %299 = vadd.xlane.f32.xlu0 %v298_v22  ;;  %v285_v25 = vmul.f32 %v392_v13, %v274_v21 }
 0x2d5   :  { %v295_v26 = vadd.f32 %v393_v15, %v284_v23  ;;  %v275_v27 = vmul.f32 %v439_v24, %v243_v55 }
 0x2d6   :  { %v296_v28 = vadd.f32 %v393_v15, %v285_v25 }
 0x2d7   :  { %v301_v29 = vsel %vm62_vm0, %v295_v26, 0.0  ;;  %v286_v30 = vmul.f32 %v392_v13, %v275_v27 }
 0x2d8   :  { %302 = vadd.xlane.f32.xlu1 %v301_v29  ;;  %v304_v31 = vsel %vm62_vm0, %v296_v28, 0.0 }
 0x2d9   :  { %305 = vadd.xlane.f32.xlu0 %v304_v31  ;;  %v297_v32 = vadd.f32 %v393_v15, %v286_v30 }
 0x2db   :  { %v307_v33 = vsel %vm62_vm0, %v297_v32, 0.0 }
 0x2dc   :  { %308 = vadd.xlane.f32.xlu1 %v307_v33 }
 0x35d   :  { %v300_v34 = vpop.xlane.xlu0 %299 }
 0x35e   :  { %v310_v35 = vmul.f32 0.03125, %v300_v34 }
 0x360   :  { %v314_v36 = vsub.f32 %v294_v19, %v310_v35 }
 0x361   :  { %v303_v37 = vpop.xlane.xlu1 %302 }
 0x362   :  { %v311_v38 = vmul.f32 0.03125, %v303_v37  ;;  %v306_v39 = vpop.xlane.xlu0 %305  ;;  %v318_v40 = vmul.f32 %v314_v36, %v314_v36 }
 0x363   :  { %v312_v41 = vmul.f32 0.03125, %v306_v39 }
 0x364   :  { %v315_v42 = vsub.f32 %v295_v26, %v311_v38  ;;  %v322_v43 = vsel %vm62_vm0, %v318_v40, 0.0 }
 0x365   :  { %v316_v44 = vsub.f32 %v296_v28, %v312_v41  ;;  %v309_v45 = vpop.xlane.xlu1 %308  ;;  %323 = vadd.xlane.f32.xlu0 %v322_v43 }
 0x366   :  { %v313_v46 = vmul.f32 0.03125, %v309_v45  ;;  %v319_v47 = vmul.f32 %v315_v42, %v315_v42 }
 0x367   :  { %v320_v48 = vmul.f32 %v316_v44, %v316_v44 }
 0x368   :  { %v317_v49 = vsub.f32 %v297_v32, %v313_v46  ;;  %v325_v50 = vsel %vm62_vm0, %v319_v47, 0.0 }
 0x369   :  { %326 = vadd.xlane.f32.xlu1 %v325_v50  ;;  %v328_v51 = vsel %vm62_vm0, %v320_v48, 0.0 }
 0x36a   :  { %329 = vadd.xlane.f32.xlu0 %v328_v51  ;;  %v321_v52 = vmul.f32 %v317_v49, %v317_v49 }
 0x36c   :  { %v331_v53 = vsel %vm62_vm0, %v321_v52, 0.0 }
 0x36d   :  { %332 = vadd.xlane.f32.xlu1 %v331_v53 }
 0x3ee   :  { %v324_v54 = vpop.xlane.xlu0 %323 }
 0x3ef   :  { %v334_v55 = vmul.f32 0.03125, %v324_v54 }
 0x3f1   :  { %v338_v56 = vadd.f32 1e-05, %v334_v55 }
 0x3f2   :  { %v327_v57 = vpop.xlane.xlu1 %326 }
 0x3f3   :  { %440 = vrsqrt.f32 %v338_v56  ;;  %v335_v58 = vmul.f32 0.03125, %v327_v57  ;;  %v330_v59 = vpop.xlane.xlu0 %329 }
 0x3f4   :  { %v336_v60 = vmul.f32 0.03125, %v330_v59 }
 0x3f5   :  { %v339_v61 = vadd.f32 1e-05, %v335_v58 }
 0x3f6   :  { %v340_v62 = vadd.f32 1e-05, %v336_v60  ;;  %v333_v63 = vpop.xlane.xlu1 %332 }
 0x3f7   :  { %442 = vrsqrt.f32 %v339_v61  ;;  %v337_v0 = vmul.f32 0.03125, %v333_v63 }
 0x3f8   :  { %444 = vrsqrt.f32 %v340_v62 }
 0x3f9   :  { %v341_v1 = vadd.f32 1e-05, %v337_v0 }
 0x3fb   :  { %446 = vrsqrt.f32 %v341_v1 }
 0x400   :  { %v441_v2 = vpop.eup %440 }
 0x401   :  { %v346_v4 = vmul.f32 %v441_v2, %v314_v36 }
 0x403   :  { %v357_v6 = vmul.f32 %v394_v3, %v346_v4 }
 0x404   :  { %v443_v7 = vpop.eup %442 }
 0x405   :  { %v445_v8 = vpop.eup %444  ;;  %v368_v9 = vadd.f32 %v395_v5, %v357_v6  ;;  %v347_v10 = vmul.f32 %v443_v7, %v315_v42 }
 0x406   :  { %v348_v11 = vmul.f32 %v445_v8, %v316_v44 }
 0x407   :  { %372 = vst.msk [vmem:[%s589_s9] sm:$0xff] %vm62_vm0, %v368_v9  ;;  %v358_v12 = vmul.f32 %v394_v3, %v347_v10 }
 0x408   :  { %v447_v13 = vpop.eup %446  ;;  %v359_v14 = vmul.f32 %v394_v3, %v348_v11 }
 0x409   :  { %v369_v15 = vadd.f32 %v395_v5, %v358_v12  ;;  %v349_v16 = vmul.f32 %v447_v13, %v317_v49 }
 0x40a   :  { %v370_v17 = vadd.f32 %v395_v5, %v359_v14 }
 0x40b   :  { %373 = vst.msk [vmem:[%s589_s9 + $0x8] sm:$0xff] %vm62_vm0, %v369_v15  ;;  %v360_v18 = vmul.f32 %v394_v3, %v349_v16 }
 0x40c   :  { %374 = vst.msk [vmem:[%s589_s9 + $0x10] sm:$0xff] %vm62_vm0, %v370_v17 }
 0x40d   :  { %v371_v19 = vadd.f32 %v395_v5, %v360_v18 }
 0x40f   :  { %375 = vst.msk [vmem:[%s589_s9 + $0x18] sm:$0xff] %vm62_vm0, %v371_v19 }

// kernel: transformer_encoder_forward.5
= control target key start
LH: loop header
LB: loop body
LE: loop exit
PB: predicated region body
PF: predicated region fallthrough
CT: control target
= control target key end

     0   :  { %vm62_vm0 = vcmask 261120   ;;  %vm163_vm1 = vcmask 523264   ;;  %s482_s1 = inlined_call_operand.vmem [shape: bf16[32,64], index: 1, kind: input, shape index: {}]   ;;  %s483_s7 = inlined_call_operand.vmem [shape: f32[1,32], index: 7, kind: input, shape index: {}, may-alias: {5,7}]   ;;  %s484_s8 = inlined_call_operand.vmem [shape: f32[1,32], index: 8, kind: input, shape index: {}, may-alias: {6,8}]   ;;  %s485_s0 = inlined_call_operand.vmem [shape: f32[32,32], index: 0, kind: input, shape index: {}]   ;;  %s486_s3 = inlined_call_operand.vmem [shape: bf16[64,32], index: 3, kind: input, shape index: {}]   ;;  %s487_s2 = inlined_call_operand.vmem [shape: f32[1,64], index: 2, kind: input, shape index: {}]   ;;  %s488_s4 = inlined_call_operand.vmem [shape: f32[1,32], index: 4, kind: input, shape index: {}]   ;;  %s489_s5 = inlined_call_operand.vmem [shape: f32[1,32], index: 5, kind: input, shape index: {}, may-alias: {5,7}]   ;;  %s490_s6 = inlined_call_operand.vmem [shape: f32[1,32], index: 6, kind: input, shape index: {}, may-alias: {6,8}]   ;;  %s491_s9 = inlined_call_operand.vmem [shape: f32[32,32], index: 9, kind: output, shape index: {}]  }
   0x1   :  { %v350_v0 = vld [vmem:[%s482_s1 + $0x8] sm:$0xff]   ;;  %v351_v1 = vld [vmem:[%s482_s1] sm:$0xff]   ;;  %v35_v4 = vld [vmem:[%s485_s0 + $0x10] sm:$0xff] }
   0x2   :  { %330 = vmatprep.subr.bf16.mxu0 %v350_v0  ;;  %v33_v2 = vld [vmem:[%s485_s0] sm:$0xff]  ;;  %v34_v3 = vld [vmem:[%s485_s0 + $0x8] sm:$0xff]  ;;  %v36_v6 = vld [vmem:[%s485_s0 + $0x18] sm:$0xff] }
   0x3   :  { %331 = vmatpush3.bf16.msra.mxu0 %v350_v0  ;;  %v37_v5 = vpack.c.bf16 %v34_v3, %v33_v2  ;;  %v352_v7 = vld [vmem:[%s486_s3 + $0x18] sm:$0xff]   ;;  %v38_v8 = vpack.c.bf16 %v36_v6, %v35_v4  ;;  %v353_v9 = vld [vmem:[%s486_s3 + $0x10] sm:$0xff]   ;;  %v354_v10 = vld [vmem:[%s486_s3 + $0x8] sm:$0xff]  }
   0x4   :  { %332 = vmatprep.subr.bf16.mxu0 %v351_v1  ;;  %338 = vmatprep.subr.bf16.mxu1 %v352_v7  ;;  %v355_v11 = vld [vmem:[%s486_s3] sm:$0xff]  }
   0x5   :  { %334 = vmatprep.mubr.msk.bf16.mxu0 %vm62_vm0, %v37_v5  ;;  %339 = vmatpush3.bf16.msra.mxu1 %v352_v7  ;;  %v306_v14 = vld [vmem:[%s487_s2] ss:$0 sm:$0xff] }
   0x6   :  { %340 = vmatprep.subr.bf16.mxu1 %v353_v9  ;;  %v311_v27 = vld [vmem:[%s488_s4] ss:$0 sm:$0xff] }
   0x7   :  { %333 = vmatpush3.bf16.msra.mxu0 %v351_v1 }
   0x9   :  { %341 = vmatpush3.bf16.msra.mxu1 %v353_v9 }
   0xa   :  { %335 = vmatmul.mubr.msk.bf16.vlgmr.msra.gmra.mxu0 %vm62_vm0, %v38_v8  ;;  %342 = vmatprep.subr.bf16.mxu1 %v354_v10 }
   0xd   :  { %343 = vmatpush3.bf16.msra.mxu1 %v354_v10 }
   0xe   :  { %344 = vmatprep.subr.bf16.mxu1 %v355_v11 }
  0x11   :  { %345 = vmatpush3.bf16.msra.mxu1 %v355_v11 }
  0xca   :  { %v336_v12 = vpop.f32.mrf.mxu0 }
  0xcb   :  { %v112_v18 = vadd.f32 %v336_v12, %v306_v14 }
  0xcc   :  { %v103_v13 = vpop.f32.mrf.mxu0 }
  0xcd   :  { %v104_v16 = vadd.f32 %v306_v14, %v103_v13  ;;  %v120_v24 = vmax.f32 %v112_v18, 0.0  ;;  %v318_v13 = vld [vmem:[%s489_s5] ss:$0 sm:$0xff] }
  0xce   :  { %v337_v15 = vpop.f32.mrf.mxu0 }
  0xcf   :  { %v115_v17 = vadd.f32 %v337_v15, %v306_v14  ;;  %v118_v22 = vmax.f32 %v104_v16, 0.0  ;;  %v319_v15 = vld [vmem:[%s490_s6] ss:$0 sm:$0xff] }
  0xd0   :  { %v106_v19 = vpop.f32.mrf.mxu0 }
  0xd1   :  { %v107_v20 = vadd.f32 %v306_v14, %v106_v19  ;;  %v121_v21 = vmax.f32 %v115_v17, 0.0 }
  0xd3   :  { %v119_v23 = vmax.f32 %v107_v20, 0.0  ;;  %v123_v26 = vpack.c.bf16 %v121_v21, %v120_v24 }
  0xd5   :  { %v122_v25 = vpack.c.bf16 %v119_v23, %v118_v22 }
  0xd7   :  { %346 = vmatprep.mubr.msk.bf16.mxu1 %vm163_vm1, %v122_v25 }
  0xd8   :  { %347 = vmatmul.mubr.msk.bf16.vlgmr.msra.gmra.mxu1 %vm163_vm1, %v123_v26 }
 0x198   :  { %v348_v28 = vpop.f32.mrf.mxu1 }
 0x199   :  { %v213_v29 = vadd.f32 %v348_v28, %v311_v27 }
 0x19a   :  { %v204_v30 = vpop.f32.mrf.mxu1 }
 0x19b   :  { %v205_v31 = vadd.f32 %v311_v27, %v204_v30  ;;  %v221_v32 = vadd.f32 %v213_v29, %v35_v4 }
 0x19c   :  { %v349_v33 = vpop.f32.mrf.mxu1 }
 0x19d   :  { %v216_v34 = vadd.f32 %v349_v33, %v311_v27  ;;  %v229_v35 = vsel %vm62_vm0, %v221_v32, 0.0  ;;  %v219_v36 = vadd.f32 %v205_v31, %v33_v2 }
 0x19e   :  { %230 = vadd.xlane.f32.xlu1 %v229_v35  ;;  %v207_v37 = vpop.f32.mrf.mxu1 }
 0x19f   :  { %v208_v38 = vadd.f32 %v311_v27, %v207_v37  ;;  %v223_v39 = vsel %vm62_vm0, %v219_v36, 0.0  ;;  %v222_v40 = vadd.f32 %v216_v34, %v36_v6 }
 0x1a0   :  { %224 = vadd.xlane.f32.xlu0 %v223_v39 }
 0x1a1   :  { %v232_v41 = vsel %vm62_vm0, %v222_v40, 0.0  ;;  %v220_v42 = vadd.f32 %v208_v38, %v34_v3 }
 0x1a2   :  { %233 = vadd.xlane.f32.xlu1 %v232_v41 }
 0x1a3   :  { %v226_v43 = vsel %vm62_vm0, %v220_v42, 0.0 }
 0x1a4   :  { %227 = vadd.xlane.f32.xlu0 %v226_v43 }
 0x227   :  { %v231_v44 = vpop.xlane.xlu1 %230 }
 0x228   :  { %v238_v45 = vmul.f32 0.03125, %v231_v44 }
 0x229   :  { %v225_v46 = vpop.xlane.xlu0 %224 }
 0x22a   :  { %v236_v47 = vmul.f32 0.03125, %v225_v46  ;;  %v242_v49 = vsub.f32 %v221_v32, %v238_v45 }
 0x22b   :  { %v234_v48 = vpop.xlane.xlu1 %233 }
 0x22c   :  { %v240_v50 = vsub.f32 %v219_v36, %v236_v47  ;;  %v239_v51 = vmul.f32 0.03125, %v234_v48  ;;  %v246_v58 = vmul.f32 %v242_v49, %v242_v49 }
 0x22d   :  { %v228_v52 = vpop.xlane.xlu0 %227 }
 0x22e   :  { %v237_v53 = vmul.f32 0.03125, %v228_v52  ;;  %v244_v54 = vmul.f32 %v240_v50, %v240_v50  ;;  %v243_v55 = vsub.f32 %v222_v40, %v239_v51  ;;  %v254_v60 = vsel %vm62_vm0, %v246_v58, 0.0 }
 0x230   :  { %v241_v56 = vsub.f32 %v220_v42, %v237_v53  ;;  %v248_v57 = vsel %vm62_vm0, %v244_v54, 0.0  ;;  %v247_v62 = vmul.f32 %v243_v55, %v243_v55 }
 0x231   :  { %249 = vadd.xlane.f32.xlu0 %v248_v57 }
 0x232   :  { %v245_v59 = vmul.f32 %v241_v56, %v241_v56  ;;  %v257_v63 = vsel %vm62_vm0, %v247_v62, 0.0 }
 0x234   :  { %v251_v61 = vsel %vm62_vm0, %v245_v59, 0.0 }
 0x235   :  { %255 = vadd.xlane.f32.xlu0 %v254_v60  ;;  %252 = vadd.xlane.f32.xlu1 %v251_v61 }
 0x239   :  { %258 = vadd.xlane.f32.xlu1 %v257_v63 }
 0x2ba   :  { %v250_v0 = vpop.xlane.xlu0 %249 }
 0x2bb   :  { %v260_v1 = vmul.f32 0.03125, %v250_v0 }
 0x2bd   :  { %v264_v2 = vadd.f32 1e-05, %v260_v1 }
 0x2be   :  { %v253_v3 = vpop.xlane.xlu1 %252  ;;  %v256_v4 = vpop.xlane.xlu0 %255 }
 0x2bf   :  { %356 = vrsqrt.f32 %v264_v2  ;;  %v261_v5 = vmul.f32 0.03125, %v253_v3  ;;  %v262_v6 = vmul.f32 0.03125, %v256_v4 }
 0x2c1   :  { %v265_v7 = vadd.f32 1e-05, %v261_v5  ;;  %v266_v8 = vadd.f32 1e-05, %v262_v6 }
 0x2c2   :  { %v259_v9 = vpop.xlane.xlu1 %258 }
 0x2c3   :  { %358 = vrsqrt.f32 %v265_v7  ;;  %v263_v10 = vmul.f32 0.03125, %v259_v9 }
 0x2c4   :  { %360 = vrsqrt.f32 %v266_v8 }
 0x2c5   :  { %v267_v11 = vadd.f32 1e-05, %v263_v10 }
 0x2c7   :  { %362 = vrsqrt.f32 %v267_v11 }
 0x2cc   :  { %v357_v12 = vpop.eup %356 }
 0x2cd   :  { %v272_v14 = vmul.f32 %v357_v12, %v240_v50 }
 0x2cf   :  { %v283_v16 = vmul.f32 %v318_v13, %v272_v14 }
 0x2d0   :  { %v359_v17 = vpop.eup %358 }
 0x2d1   :  { %v361_v18 = vpop.eup %360  ;;  %v294_v19 = vadd.f32 %v319_v15, %v283_v16  ;;  %v273_v20 = vmul.f32 %v359_v17, %v241_v56 }
 0x2d2   :  { %v274_v21 = vmul.f32 %v361_v18, %v242_v49 }
 0x2d3   :  { %298 = vst.msk [vmem:[%s491_s9] sm:$0xff] %vm62_vm0, %v294_v19  ;;  %v284_v22 = vmul.f32 %v318_v13, %v273_v20 }
 0x2d4   :  { %v363_v23 = vpop.eup %362  ;;  %v285_v24 = vmul.f32 %v318_v13, %v274_v21 }
 0x2d5   :  { %v295_v25 = vadd.f32 %v319_v15, %v284_v22  ;;  %v275_v26 = vmul.f32 %v363_v23, %v243_v55 }
 0x2d6   :  { %v296_v27 = vadd.f32 %v319_v15, %v285_v24 }
 0x2d7   :  { %299 = vst.msk [vmem:[%s491_s9 + $0x8] sm:$0xff] %vm62_vm0, %v295_v25  ;;  %v286_v28 = vmul.f32 %v318_v13, %v275_v26 }
 0x2d8   :  { %300 = vst.msk [vmem:[%s491_s9 + $0x10] sm:$0xff] %vm62_vm0, %v296_v27 }
 0x2d9   :  { %v297_v29 = vadd.f32 %v319_v15, %v286_v28 }
 0x2db   :  { %301 = vst.msk [vmem:[%s491_s9 + $0x18] sm:$0xff] %vm62_vm0, %v297_v29 }

// kernel: transformer_encoder_forward.4
= control target key start
LH: loop header
LB: loop body
LE: loop exit
PB: predicated region body
PF: predicated region fallthrough
CT: control target
= control target key end

     0   :  { %s2827_s21 = smov 0   ;;  %s3173_s0 = inlined_call_operand.vmem [shape: f32[2,16,32], index: 0, kind: input, shape index: {}]   ;;  %s3174_s1 = inlined_call_operand.vmem [shape: f32[2,16,32], index: 1, kind: input, shape index: {}]   ;;  %s3175_s2 = inlined_call_operand.vmem [shape: bf16[4,32,8], index: 2, kind: input, shape index: {}]   ;;  %s3176_s3 = inlined_call_operand.vmem [shape: f32[4,1,8], index: 3, kind: input, shape index: {}]   ;;  %s3177_s4 = inlined_call_operand.vmem [shape: bf16[4,32,8], index: 4, kind: input, shape index: {}]   ;;  %s3178_s5 = inlined_call_operand.vmem [shape: f32[4,1,8], index: 5, kind: input, shape index: {}]   ;;  %s3179_s6 = inlined_call_operand.vmem [shape: bf16[4,32,8], index: 6, kind: input, shape index: {}]   ;;  %s3180_s7 = inlined_call_operand.vmem [shape: f32[4,1,8], index: 7, kind: input, shape index: {}]   ;;  %s3181_s8 = inlined_call_operand.vmem [shape: bf16[4,8,32], index: 8, kind: input, shape index: {}]   ;;  %s3182_s9 = inlined_call_operand.vmem [shape: f32[1,32], index: 9, kind: input, shape index: {}]   ;;  %s3183_s10 = inlined_call_operand.vmem [shape: f32[1,32], index: 10, kind: input, shape index: {}]   ;;  %s3184_s11 = inlined_call_operand.vmem [shape: f32[1,32], index: 11, kind: input, shape index: {}]   ;;  %s3185_s12 = inlined_call_operand.vmem [shape: f32[2,16,32], index: 12, kind: output, shape index: {}]  }
   0x1 LB: > { %s2256_s22 = sadd.s32 4294967295, %s2758_s21   ;;  %p2260_p0 = scmp.ge.s32.totalorder %s2758_s21, 1  ;;  %s2758_s21 = sphi %s2827_s21, %s22_s21  }
   0x2   : > { %p372_p1 = scmp.lt.s32.totalorder %s2758_s21, 3 }
   0x4   : > { %p373_p2 = pnand %p2260_p0, %p372_p1 }
   0x5   : > { %p419_p3 = scmp.lt.s32.totalorder (!%p373_p2), %s2256_s22, 1 }
   0x6   : > { %376 = sbr.rel (%p373_p2) target bundleno = 1500 (0x5dc), region = 68 }
   0xb   : > { %v2678_v0 = vld [vmem:[%s3175_s2 + $0x8] sm:$0xff]   ;;  %v2760_v1 = vmov 0.0   ;;  %v2680_v3 = vld [vmem:[%s3175_s2] sm:$0xff]   ;;  %vm2761_vm0 = vmmov 0   ;;  %s3187_s22 = smov (!%p419_p3, %s2256_s22), 1  ;;  %vm466_vm1 = vcmask 261120  }
   0xc   : > { %2500 = vmatprep.subr.bf16.mxu0 %v2760_v1  ;;  %2508 = vmatprep.subr.bf16.mxu1 %v2760_v1  ;;  %v2679_v2 = vld [vmem:[%s3177_s4 + $0x8] sm:$0xff]   ;;  %v2681_v4 = vld [vmem:[%s3177_s4] sm:$0xff]   ;;  %s2855_s13 = sshll.u32 %s3187_s22, 4  ;;  %v2683_v12 = vld [vmem:[%s3175_s2 + $0x18] sm:$0xff]   ;;  %vm652_vm2 = vcmask 60416   ;;  %vm1408_vm3 = vcmask 64512  }
   0xd   : > { %2501 = vmatpush3.bf16.msra.mxu0 %v2678_v0  ;;  %2504 = vmatprep.mubr.msk.bf16.mxu0 %vm2761_vm0, %v2760_v1  ;;  %s2861_s16 = scalar_lea.vmem %s3173_s0, %s2855_s13  ;;  %s428_s19 = scalar_lea.vmem %s3174_s1, %s2855_s13  ;;  %v2682_v11 = vld [vmem:[%s3179_s6 + $0x8] sm:$0xff]   ;;  %v2684_v14 = vld [vmem:[%s3179_s6] sm:$0xff]   ;;  %v2685_v15 = vld [vmem:[%s3175_s2 + $0x10] sm:$0xff]   ;;  %vm1627_vm4 = vcmask 130048   ;;  %vm1931_vm5 = vcmask 1043456  }
   0xe   : > { %2509 = vmatpush3.bf16.msra.mxu1 %v2679_v2  ;;  %2502 = vmatprep.subr.bf16.mxu0 %v2760_v1  ;;  %v435_v5 = vld [vmem:[%s2861_s16] sm:$0xff]  ;;  %v436_v6 = vld [vmem:[%s2861_s16 + $0x8] sm:$0xff]  ;;  %v2686_v17 = vld [vmem:[%s3177_s4 + $0x18] sm:$0xff]   ;;  %s433_s25 = scalar_lea.vmem %s3185_s12, %s2855_s13 }
   0xf   : > { %2510 = vmatprep.subr.bf16.mxu1 %v2760_v1  ;;  %2512 = vmatprep.mubr.msk.bf16.mxu1 %vm2761_vm0, %v2760_v1  ;;  %v437_v7 = vld [vmem:[%s428_s19] sm:$0xff]  ;;  %v438_v8 = vld [vmem:[%s428_s19 + $0x8] sm:$0xff]  ;;  %v2895_v16 = vpack.c.bf16 %v436_v6, %v435_v5  ;;  %v2687_v18 = vld [vmem:[%s3179_s6 + $0x18] sm:$0xff]  }
  0x10   : > { %v439_v9 = vadd.f32 %v437_v7, %v435_v5  ;;  %v440_v10 = vadd.f32 %v438_v8, %v436_v6  ;;  %v2688_v19 = vld [vmem:[%s3177_s4 + $0x10] sm:$0xff]   ;;  %v2690_v21 = vld [vmem:[%s3175_s2 + $0x28] sm:$0xff]   ;;  %v2692_v23 = vld [vmem:[%s3175_s2 + $0x20] sm:$0xff]  }
  0x11   : > { %2503 = vmatpush3.bf16.msra.mxu0 %v2680_v3  ;;  %v2689_v20 = vld [vmem:[%s3179_s6 + $0x10] sm:$0xff]   ;;  %v2691_v22 = vld [vmem:[%s3177_s4 + $0x28] sm:$0xff]   ;;  %v2693_v24 = vld [vmem:[%s3177_s4 + $0x20] sm:$0xff]  }
  0x12   : > { %2511 = vmatpush3.bf16.msra.mxu1 %v2681_v4  ;;  %2516 = vmatprep.subr.bf16.mxu0 %v2760_v1  ;;  %v2877_v13 = vpack.c.bf16 %v440_v10, %v439_v9  ;;  %v2694_v25 = vld [vmem:[%s3179_s6 + $0x28] sm:$0xff]   ;;  %v2697_v26 = vld [vmem:[%s3175_s2 + $0x38] sm:$0xff]   ;;  %v2695_v27 = vld [vmem:[%s3179_s6 + $0x20] sm:$0xff]  }
  0x13   : > { %2524 = vmatprep.subr.bf16.mxu1 %v2760_v1  ;;  %v2699_v28 = vld [vmem:[%s3175_s2 + $0x30] sm:$0xff]   ;;  %v2696_v29 = vld [vmem:[%s3177_s4 + $0x38] sm:$0xff]   ;;  %v2267_v33 = vld [vmem:[%s3176_s3] ss:$0 sm:$0xff] }
  0x14   : > { %2505 = vmatmul.mubr.msk.bf16.vlgmr.msra.gmra.mxu0 %vm466_vm1, %v2877_v13  ;;  %v2698_v30 = vld [vmem:[%s3177_s4 + $0x30] sm:$0xff]   ;;  %v2702_v31 = vld [vmem:[%s3179_s6 + $0x38] sm:$0xff]   ;;  %v2271_v34 = vld [vmem:[%s3178_s5] ss:$0 sm:$0xff] }
  0x15   : > { %2513 = vmatmul.mubr.msk.bf16.vlgmr.msra.gmra.mxu1 %vm466_vm1, %v2877_v13  ;;  %2517 = vmatpush3.bf16.msra.mxu0 %v2682_v11  ;;  %v2703_v32 = vld [vmem:[%s3179_s6 + $0x30] sm:$0xff]   ;;  %v2275_v50 = vld [vmem:[%s3180_s7] ss:$0 sm:$0xff]  ;;  %v2290_v51 = vld [vmem:[%s3176_s3 + $0x1] ss:$0 sm:$0xff] }
  0x16   : > { %2525 = vmatpush3.bf16.msra.mxu1 %v2683_v12  ;;  %2518 = vmatprep.subr.bf16.mxu0 %v2760_v1  ;;  %v2299_v7 = vld [vmem:[%s3178_s5 + $0x1] ss:$0 sm:$0xff] }
  0x17   : > { %2526 = vmatprep.subr.bf16.mxu1 %v2760_v1  ;;  %2520 = vmatprep.mubr.msk.bf16.mxu0 %vm2761_vm0, %v2760_v1  ;;  %v2308_v8 = vld [vmem:[%s3180_s7 + $0x1] ss:$0 sm:$0xff] }
  0x18   : > { %2528 = vmatprep.mubr.msk.bf16.mxu1 %vm2761_vm0, %v2760_v1 }
  0x19   : > { %2519 = vmatpush3.bf16.msra.mxu0 %v2684_v14 }
  0x1a   : > { %2527 = vmatpush3.bf16.msra.mxu1 %v2685_v15  ;;  %2532 = vmatprep.subr.bf16.mxu0 %v2760_v1 }
  0x1b   : > { %2540 = vmatprep.subr.bf16.mxu1 %v2760_v1 }
  0x1c   : > { %2521 = vmatmul.mubr.msk.bf16.vlgmr.msra.gmra.mxu0 %vm466_vm1, %v2895_v16 }
  0x1d   : > { %2529 = vmatmul.mubr.msk.bf16.vlgmr.msra.gmra.mxu1 %vm466_vm1, %v2877_v13  ;;  %2533 = vmatpush3.bf16.msra.mxu0 %v2686_v17 }
  0x1e   : > { %2541 = vmatpush3.bf16.msra.mxu1 %v2687_v18  ;;  %2534 = vmatprep.subr.bf16.mxu0 %v2760_v1 }
  0x1f   : > { %2542 = vmatprep.subr.bf16.mxu1 %v2760_v1  ;;  %2536 = vmatprep.mubr.msk.bf16.mxu0 %vm2761_vm0, %v2760_v1 }
  0x20   : > { %2544 = vmatprep.mubr.msk.bf16.mxu1 %vm2761_vm0, %v2760_v1 }
  0x21   : > { %2535 = vmatpush3.bf16.msra.mxu0 %v2688_v19 }
  0x22   : > { %2543 = vmatpush3.bf16.msra.mxu1 %v2689_v20  ;;  %2548 = vmatprep.subr.bf16.mxu0 %v2760_v1 }
  0x23   : > { %2556 = vmatprep.subr.bf16.mxu1 %v2760_v1 }
  0x24   : > { %2537 = vmatmul.mubr.msk.bf16.vlgmr.msra.gmra.mxu0 %vm466_vm1, %v2877_v13 }
  0x25   : > { %2545 = vmatmul.mubr.msk.bf16.vlgmr.msra.gmra.mxu1 %vm466_vm1, %v2895_v16  ;;  %2549 = vmatpush3.bf16.msra.mxu0 %v2690_v21 }
  0x26   : > { %2557 = vmatpush3.bf16.msra.mxu1 %v2691_v22  ;;  %2550 = vmatprep.subr.bf16.mxu0 %v2760_v1 }
  0x27   : > { %2558 = vmatprep.subr.bf16.mxu1 %v2760_v1  ;;  %2552 = vmatprep.mubr.msk.bf16.mxu0 %vm2761_vm0, %v2760_v1 }
  0x28   : > { %2560 = vmatprep.mubr.msk.bf16.mxu1 %vm2761_vm0, %v2760_v1 }
  0x29   : > { %2551 = vmatpush3.bf16.msra.mxu0 %v2692_v23 }
  0x2a   : > { %2559 = vmatpush3.bf16.msra.mxu1 %v2693_v24  ;;  %2564 = vmatprep.subr.bf16.mxu0 %v2760_v1 }
  0x2b   : > { %2572 = vmatprep.subr.bf16.mxu1 %v2760_v1 }
  0x2c   : > { %2553 = vmatmul.mubr.msk.bf16.vlgmr.msra.gmra.mxu0 %vm466_vm1, %v2877_v13 }
  0x2d   : > { %2561 = vmatmul.mubr.msk.bf16.vlgmr.msra.gmra.mxu1 %vm466_vm1, %v2877_v13  ;;  %2565 = vmatpush3.bf16.msra.mxu0 %v2694_v25 }
  0x2e   : > { %2568 = vmatprep.mubr.msk.bf16.mxu0 %vm2761_vm0, %v2760_v1  ;;  %2566 = vmatprep.subr.bf16.mxu0 %v2760_v1 }
  0x2f   : > { %2573 = vmatpush3.bf16.msra.mxu1 %v2697_v26  ;;  %2576 = vmatprep.mubr.msk.bf16.mxu1 %vm2761_vm0, %v2760_v1 }
  0x30   : > { %2574 = vmatprep.subr.bf16.mxu1 %v2760_v1 }
  0x31   : > { %2567 = vmatpush3.bf16.msra.mxu0 %v2695_v27 }
  0x32   : > { %2580 = vmatprep.subr.bf16.mxu0 %v2760_v1 }
  0x33   : > { %2575 = vmatpush3.bf16.msra.mxu1 %v2699_v28  ;;  %v2323_v28 = vld [vmem:[%s3176_s3 + $0x2] ss:$0 sm:$0xff] }
  0x34   : > { %2588 = vmatprep.subr.bf16.mxu1 %v2760_v1  ;;  %2569 = vmatmul.mubr.msk.bf16.vlgmr.msra.gmra.mxu0 %vm466_vm1, %v2895_v16 }
  0x35   : > { %2581 = vmatpush3.bf16.msra.mxu0 %v2696_v29  ;;  %2584 = vmatprep.mubr.msk.bf16.mxu0 %vm2761_vm0, %v2760_v1  ;;  %v2332_v29 = vld [vmem:[%s3178_s5 + $0x2] ss:$0 sm:$0xff] }
  0x36   : > { %2582 = vmatprep.subr.bf16.mxu0 %v2760_v1  ;;  %2577 = vmatmul.mubr.msk.bf16.vlgmr.msra.gmra.mxu1 %vm466_vm1, %v2877_v13 }
  0x37   : > { %2592 = vmatprep.mubr.msk.bf16.mxu1 %vm2761_vm0, %v2760_v1  ;;  %2589 = vmatpush3.bf16.msra.mxu1 %v2702_v31 }
  0x38   : > { %2590 = vmatprep.subr.bf16.mxu1 %v2760_v1 }
  0x39   : > { %2583 = vmatpush3.bf16.msra.mxu0 %v2698_v30 }
  0x3a   : > { %2596 = vmatprep.subr.bf16.mxu0 %v2760_v1 }
  0x3b   : > { %2591 = vmatpush3.bf16.msra.mxu1 %v2703_v32 }
  0x3c   : > { %2585 = vmatmul.mubr.msk.bf16.vlgmr.msra.gmra.mxu0 %vm466_vm1, %v2877_v13  ;;  %2602 = vmatprep.subr.bf16.mxu1 %v2760_v1 }
  0x3d   : > { %2598 = vmatprep.mubr.msk.bf16.mxu0 %vm2761_vm0, %v2760_v1 }
  0x3e   : > { %2593 = vmatmul.mubr.msk.bf16.vlgmr.msra.gmra.mxu1 %vm466_vm1, %v2895_v16 }
  0x3f   : > { %2604 = vmatprep.mubr.msk.bf16.mxu1 %vm2761_vm0, %v2760_v1 }
  0xd4   : > { %v504_v35 = vpop.f32.mrf.mxu0 }
  0xd5   : > { %v568_v36 = vpop.f32.mrf.mxu1  ;;  %v505_v37 = vadd.f32 %v2267_v33, %v504_v35 }
  0xd6   : > { %v569_v38 = vadd.f32 %v2271_v34, %v568_v36  ;;  %v2506_v39 = vpop.f32.mrf.mxu0 }
  0xd7   : > { %v2514_v40 = vpop.f32.mrf.mxu1  ;;  %v642_v41 = vmul.f32 0.35355338, %v505_v37 }
  0xd8   : > { %v2418_v42 = vpack.c.bf16 %v569_v38, %v569_v38  ;;  %v507_v43 = vpop.f32.mrf.mxu0 }
  0xd9   : > { %v571_v44 = vpop.f32.mrf.mxu1  ;;  %v2416_v45 = vpack.c.bf16 %v642_v41, %v642_v41  ;;  %v508_v46 = vadd.f32 %v2267_v33, %v507_v43 }
  0xda   : > { %663 = vst.msk [vmem:[#allocation3] sm:$0xf] %vm652_vm2, %v2418_v42  ;;  %v572_v47 = vadd.f32 %v2271_v34, %v571_v44  ;;  %v2507_v48 = vpop.f32.mrf.mxu0 }
  0xdb   : > { %v2515_v49 = vpop.f32.mrf.mxu1  ;;  %653 = vst.msk [vmem:[#allocation2] sm:$0xf] %vm652_vm2, %v2416_v45  ;;  %v643_v52 = vmul.f32 0.35355338, %v508_v46 }
  0xdc   : > { %v2419_v53 = vpack.c.bf16 %v572_v47, %v572_v47  ;;  %v635_v54 = vpop.f32.mrf.mxu0  ;;  %v2341_v47 = vld [vmem:[%s3180_s7 + $0x2] ss:$0 sm:$0xff] }
  0xdd   : > { %v734_v55 = vpop.f32.mrf.mxu1  ;;  %v2417_v56 = vpack.c.bf16 %v643_v52, %v643_v52  ;;  %v636_v57 = vadd.f32 %v2275_v50, %v635_v54 }
  0xde   : > { %664 = vst.msk [vmem:[#allocation3 + $0x4] sm:$0xf] %vm652_vm2, %v2419_v53  ;;  %v735_v58 = vadd.f32 %v2290_v51, %v734_v55  ;;  %v2522_v59 = vpop.f32.mrf.mxu0 }
  0xdf   : > { %v2530_v60 = vpop.f32.mrf.mxu1  ;;  %654 = vst.msk [vmem:[#allocation2 + $0x4] sm:$0xf] %vm652_vm2, %v2417_v56  ;;  %v2420_v61 = vpack.c.bf16 %v636_v57, %v636_v57 }
  0xe0   : > { %v873_v62 = vmul.f32 0.35355338, %v735_v58  ;;  %v638_v63 = vpop.f32.mrf.mxu0 }
  0xe1   : > { %v737_v0 = vpop.f32.mrf.mxu1  ;;  %673 = vst.msk [vmem:[#allocation4] sm:$0xf] %vm652_vm2, %v2420_v61  ;;  %v639_v3 = vadd.f32 %v2275_v50, %v638_v63 }
  0xe2   : > { %v2422_v2 = vpack.c.bf16 %v873_v62, %v873_v62  ;;  %v738_v4 = vadd.f32 %v2290_v51, %v737_v0  ;;  %v2523_v5 = vpop.f32.mrf.mxu0  ;;  %v2356_v51 = vld [vmem:[%s3176_s3 + $0x3] ss:$0 sm:$0xff] }
  0xe3   : > { %v2531_v6 = vpop.f32.mrf.mxu1  ;;  %v2421_v9 = vpack.c.bf16 %v639_v3, %v639_v3  ;;  %v2365_v3 = vld [vmem:[%s3178_s5 + $0x3] ss:$0 sm:$0xff] }
  0xe4   : > { %884 = vst.msk [vmem:[#allocation2 + $0x8] sm:$0xf] %vm652_vm2, %v2422_v2  ;;  %v874_v10 = vmul.f32 0.35355338, %v738_v4  ;;  %v800_v11 = vpop.f32.mrf.mxu0 }
  0xe5   : > { %v866_v12 = vpop.f32.mrf.mxu1  ;;  %v2700_v13 = vld [vmem:[#allocation3] sm:$0xff]   ;;  %674 = vst.msk [vmem:[#allocation4 + $0x4] sm:$0xf] %vm652_vm2, %v2421_v9  ;;  %v801_v15 = vadd.f32 %v2299_v7, %v800_v11 }
  0xe6   : > { %v2423_v14 = vpack.c.bf16 %v874_v10, %v874_v10  ;;  %v867_v16 = vadd.f32 %v2308_v8, %v866_v12  ;;  %v2538_v17 = vpop.f32.mrf.mxu0  ;;  %v1413_v19 = vsel %vm1408_vm3, %v2700_v13, 0  ;;  %v2701_v34 = vld [vmem:[#allocation2] sm:$0xff]  }
  0xe7   : > { %v2546_v18 = vpop.f32.mrf.mxu1  ;;  %v2424_v20 = vpack.c.bf16 %v801_v15, %v801_v15  ;;  %2597 = vmatpush3.bf16.xpose.msra.mxu0 %v1413_v19 }
  0xe8   : > { %885 = vst.msk [vmem:[#allocation2 + $0xc] sm:$0xf] %vm652_vm2, %v2423_v14  ;;  %v2426_v21 = vpack.c.bf16 %v867_v16, %v867_v16  ;;  %v803_v22 = vpop.f32.mrf.mxu0  ;;  %2608 = vmatprep.subr.bf16.mxu0 %v2760_v1 }
  0xe9   : > { %v869_v23 = vpop.f32.mrf.mxu1  ;;  %895 = vst.msk [vmem:[#allocation3 + $0x8] sm:$0xf] %vm652_vm2, %v2424_v20  ;;  %v804_v24 = vadd.f32 %v2299_v7, %v803_v22 }
  0xea   : > { %906 = vst.msk [vmem:[#allocation4 + $0x8] sm:$0xf] %vm652_vm2, %v2426_v21  ;;  %v870_v25 = vadd.f32 %v2308_v8, %v869_v23  ;;  %v2539_v26 = vpop.f32.mrf.mxu0 }
  0xeb   : > { %v2547_v27 = vpop.f32.mrf.mxu1  ;;  %v2425_v30 = vpack.c.bf16 %v804_v24, %v804_v24 }
  0xec   : > { %v2427_v31 = vpack.c.bf16 %v870_v25, %v870_v25  ;;  %v967_v32 = vpop.f32.mrf.mxu0  ;;  %v2708_v23 = vld [vmem:[#allocation4] sm:$0xff]  }
  0xed   : > { %v1033_v33 = vpop.f32.mrf.mxu1  ;;  %896 = vst.msk [vmem:[#allocation3 + $0xc] sm:$0xf] %vm652_vm2, %v2425_v30  ;;  %v968_v35 = vadd.f32 %v2323_v28, %v967_v32 }
  0xee   : > { %907 = vst.msk [vmem:[#allocation4 + $0xc] sm:$0xf] %vm652_vm2, %v2427_v31  ;;  %v1034_v36 = vadd.f32 %v2332_v29, %v1033_v33  ;;  %v2554_v37 = vpop.f32.mrf.mxu0  ;;  %2599 = vmatmul.mubr.msk.bf16.vlgmr.msra.gmra.mxu0 %vm1408_vm3, %v2701_v34 }
  0xef   : > { %v2562_v38 = vpop.f32.mrf.mxu1  ;;  %v1106_v39 = vmul.f32 0.35355338, %v968_v35  ;;  %2610 = vmatprep.mubr.msk.bf16.mxu0 %vm2761_vm0, %v2760_v1  ;;  %v2705_v9 = vld [vmem:[#allocation2 + $0x8] sm:$0xff]  }
  0xf0   : > { %v2430_v40 = vpack.c.bf16 %v1034_v36, %v1034_v36  ;;  %v970_v41 = vpop.f32.mrf.mxu0 }
  0xf1   : > { %v1036_v42 = vpop.f32.mrf.mxu1  ;;  %v2428_v43 = vpack.c.bf16 %v1106_v39, %v1106_v39  ;;  %v971_v44 = vadd.f32 %v2323_v28, %v970_v41  ;;  %v2374_v28 = vld [vmem:[%s3180_s7 + $0x3] ss:$0 sm:$0xff] }
  0xf2   : > { %1128 = vst.msk [vmem:[#allocation3 + $0x10] sm:$0xf] %vm652_vm2, %v2430_v40  ;;  %v1037_v45 = vadd.f32 %v2332_v29, %v1036_v42  ;;  %v2555_v46 = vpop.f32.mrf.mxu0 }
  0xf3   : > { %v2563_v48 = vpop.f32.mrf.mxu1  ;;  %1117 = vst.msk [vmem:[#allocation2 + $0x10] sm:$0xf] %vm652_vm2, %v2428_v43  ;;  %v1107_v49 = vmul.f32 0.35355338, %v971_v44 }
  0xf4   : > { %v2431_v50 = vpack.c.bf16 %v1037_v45, %v1037_v45  ;;  %v1099_v52 = vpop.f32.mrf.mxu0  ;;  %v2704_v53 = vld [vmem:[#allocation3 + $0x8] sm:$0xff]  }
  0xf5   : > { %v2429_v54 = vpack.c.bf16 %v1107_v49, %v1107_v49  ;;  %v1100_v55 = vadd.f32 %v2341_v47, %v1099_v52  ;;  %v1470_v57 = vsel %vm1408_vm3, %v2704_v53, 0  ;;  %v2711_v27 = vld [vmem:[#allocation4 + $0x8] sm:$0xff]  }
  0xf6   : > { %1129 = vst.msk [vmem:[#allocation3 + $0x14] sm:$0xf] %vm652_vm2, %v2431_v50  ;;  %v2570_v56 = vpop.f32.mrf.mxu0  ;;  %v1200_v58 = vpop.f32.mrf.mxu1  ;;  %2603 = vmatpush3.bf16.xpose.msra.mxu1 %v1470_v57 }
  0xf7   : > { %1118 = vst.msk [vmem:[#allocation2 + $0x14] sm:$0xf] %vm652_vm2, %v2429_v54  ;;  %v2432_v59 = vpack.c.bf16 %v1100_v55, %v1100_v55  ;;  %v1201_v60 = vadd.f32 %v2356_v51, %v1200_v58  ;;  %2614 = vmatprep.subr.bf16.mxu1 %v2760_v1 }
  0xf8   : > { %v1102_v61 = vpop.f32.mrf.mxu0  ;;  %v2578_v62 = vpop.f32.mrf.mxu1 }
  0xf9   : > { %1139 = vst.msk [vmem:[#allocation4 + $0x10] sm:$0xf] %vm652_vm2, %v2432_v59  ;;  %v1103_v63 = vadd.f32 %v2341_v47, %v1102_v61  ;;  %v1339_v0 = vmul.f32 0.35355338, %v1201_v60 }
  0xfa   : > { %v2571_v2 = vpop.f32.mrf.mxu0  ;;  %v1203_v4 = vpop.f32.mrf.mxu1 }
  0xfb   : > { %v2433_v5 = vpack.c.bf16 %v1103_v63, %v1103_v63  ;;  %v2434_v6 = vpack.c.bf16 %v1339_v0, %v1339_v0  ;;  %v1204_v7 = vadd.f32 %v2356_v51, %v1203_v4 }
  0xfc   : > { %v1266_v8 = vpop.f32.mrf.mxu0  ;;  %v2579_v11 = vpop.f32.mrf.mxu1 }
  0xfd   : > { %v2706_v10 = vld [vmem:[#allocation3 + $0x10] sm:$0xff]   ;;  %1140 = vst.msk [vmem:[#allocation4 + $0x14] sm:$0xf] %vm652_vm2, %v2433_v5  ;;  %v1267_v12 = vadd.f32 %v2365_v3, %v1266_v8  ;;  %1350 = vst.msk [vmem:[#allocation2 + $0x18] sm:$0xf] %vm652_vm2, %v2434_v6  ;;  %2605 = vmatmul.mubr.msk.bf16.vlgmr.msra.gmra.mxu1 %vm1408_vm3, %v2705_v9 }
  0xfe   : > { %v1340_v13 = vmul.f32 0.35355338, %v1204_v7  ;;  %v2586_v14 = vpop.f32.mrf.mxu0  ;;  %v1527_v15 = vsel %vm1408_vm3, %v2706_v10, 0  ;;  %2616 = vmatprep.mubr.msk.bf16.mxu1 %vm2761_vm0, %v2760_v1  ;;  %v2707_v22 = vld [vmem:[#allocation2 + $0x10] sm:$0xff]   ;;  %v1332_v29 = vpop.f32.mrf.mxu1 }
  0xff   : > { %v2436_v16 = vpack.c.bf16 %v1267_v12, %v1267_v12  ;;  %2609 = vmatpush3.bf16.xpose.msra.mxu0 %v1527_v15  ;;  %v1333_v30 = vadd.f32 %v2374_v28, %v1332_v29 }
 0x100   : > { %v2435_v17 = vpack.c.bf16 %v1340_v13, %v1340_v13  ;;  %v1269_v18 = vpop.f32.mrf.mxu0  ;;  %2620 = vmatprep.subr.bf16.mxu0 %v2760_v1  ;;  %v2594_v31 = vpop.f32.mrf.mxu1 }
 0x101   : > { %1361 = vst.msk [vmem:[#allocation3 + $0x18] sm:$0xf] %vm652_vm2, %v2436_v16  ;;  %v1270_v19 = vadd.f32 %v2365_v3, %v1269_v18  ;;  %v2438_v32 = vpack.c.bf16 %v1333_v30, %v1333_v30 }
 0x102   : > { %1351 = vst.msk [vmem:[#allocation2 + $0x1c] sm:$0xf] %vm652_vm2, %v2435_v17  ;;  %v2587_v20 = vpop.f32.mrf.mxu0  ;;  %v1335_v33 = vpop.f32.mrf.mxu1 }
 0x103   : > { %v2437_v21 = vpack.c.bf16 %v1270_v19, %v1270_v19  ;;  %1372 = vst.msk [vmem:[#allocation4 + $0x18] sm:$0xf] %vm652_vm2, %v2438_v32  ;;  %v1336_v34 = vadd.f32 %v2374_v28, %v1335_v33 }
 0x104   : > { %v2595_v35 = vpop.f32.mrf.mxu1 }
 0x105   : > { %1362 = vst.msk [vmem:[#allocation3 + $0x1c] sm:$0xf] %vm652_vm2, %v2437_v21  ;;  %v2439_v36 = vpack.c.bf16 %v1336_v34, %v1336_v34 }
 0x106   : > { %2611 = vmatmul.mubr.msk.bf16.vlgmr.msra.gmra.mxu0 %vm1408_vm3, %v2707_v22 }
 0x107   : > { %2621 = vmatpush3.bf16.msra.mxu0 %v2708_v23  ;;  %2622 = vmatprep.mubr.msk.bf16.mxu0 %vm2761_vm0, %v2760_v1  ;;  %1373 = vst.msk [vmem:[#allocation4 + $0x1c] sm:$0xf] %vm652_vm2, %v2439_v36 }
 0x108   : > { %2632 = vmatprep.subr.bf16.mxu0 %v2760_v1 }
 0x109   : > { %v2710_v26 = vld [vmem:[#allocation2 + $0x18] sm:$0xff]  }
 0x10c   : > { %v2709_v24 = vld [vmem:[#allocation3 + $0x18] sm:$0xff]  }
 0x10d   : > { %v1584_v25 = vsel %vm1408_vm3, %v2709_v24, 0 }
 0x10e   : > { %2615 = vmatpush3.bf16.xpose.msra.mxu1 %v1584_v25 }
 0x10f   : > { %2626 = vmatprep.subr.bf16.mxu1 %v2760_v1 }
 0x115   : > { %2617 = vmatmul.mubr.msk.bf16.vlgmr.msra.gmra.mxu1 %vm1408_vm3, %v2710_v26 }
 0x116   : > { %2627 = vmatpush3.bf16.msra.mxu1 %v2711_v27  ;;  %2628 = vmatprep.mubr.msk.bf16.mxu1 %vm2761_vm0, %v2760_v1 }
 0x117   : > { %2638 = vmatprep.subr.bf16.mxu1 %v2760_v1 }
 0x1ae   : > { %v1449_v37 = vpop.f32.mrf.mxu0 }
 0x1af   : > { %v1628_v38 = vsel %vm1627_vm4, %v1449_v37, -inf }
 0x1b0   : > { %1629 = vmax.xlane.f32.xlu0 %v1628_v38  ;;  %v2600_v39 = vpop.f32.mrf.mxu0 }
 0x1b2   : > { %v1452_v40 = vpop.f32.mrf.mxu0 }
 0x1b3   : > { %v1631_v41 = vsel %vm1627_vm4, %v1452_v40, -inf }
 0x1b4   : > { %1632 = vmax.xlane.f32.xlu0 %v1631_v41  ;;  %v2601_v42 = vpop.f32.mrf.mxu0 }
 0x1bd   : > { %v1506_v43 = vpop.f32.mrf.mxu1 }
 0x1be   : > { %v1634_v44 = vsel %vm1627_vm4, %v1506_v43, -inf }
 0x1bf   : > { %1635 = vmax.xlane.f32.xlu1 %v1634_v44  ;;  %v2606_v45 = vpop.f32.mrf.mxu1 }
 0x1c1   : > { %v1509_v46 = vpop.f32.mrf.mxu1 }
 0x1c2   : > { %v1637_v47 = vsel %vm1627_vm4, %v1509_v46, -inf }
 0x1c3   : > { %1638 = vmax.xlane.f32.xlu1 %v1637_v47  ;;  %v2607_v48 = vpop.f32.mrf.mxu1  ;;  %v2712_v47 = vld [vmem:[#allocation4 + $0x10] sm:$0xff]  }
 0x1c6   : > { %v1563_v49 = vpop.f32.mrf.mxu0 }
 0x1c7   : > { %v1640_v50 = vsel %vm1627_vm4, %v1563_v49, -inf }
 0x1c8   : > { %1641 = vmax.xlane.f32.xlu0 %v1640_v50  ;;  %v2612_v51 = vpop.f32.mrf.mxu0 }
 0x1ca   : > { %v1566_v52 = vpop.f32.mrf.mxu0 }
 0x1cb   : > { %v1643_v53 = vsel %vm1627_vm4, %v1566_v52, -inf }
 0x1cc   : > { %1644 = vmax.xlane.f32.xlu1 %v1643_v53  ;;  %v2613_v54 = vpop.f32.mrf.mxu0 }
 0x1d5   : > { %v1620_v55 = vpop.f32.mrf.mxu1 }
 0x1d6   : > { %v1646_v56 = vsel %vm1627_vm4, %v1620_v55, -inf }
 0x1d7   : > { %v2618_v57 = vpop.f32.mrf.mxu1  ;;  %1647 = vmax.xlane.f32.xlu0 %v1646_v56 }
 0x1d9   : > { %v1623_v58 = vpop.f32.mrf.mxu1 }
 0x1da   : > { %v1649_v59 = vsel %vm1627_vm4, %v1623_v58, -inf }
 0x1db   : > { %v2619_v60 = vpop.f32.mrf.mxu1  ;;  %1650 = vmax.xlane.f32.xlu1 %v1649_v59 }
 0x239   : > { %v1630_v61 = vpop.xlane.xlu0 %1629 }
 0x23a   : > { %v1652_v62 = vsub.f32 %v1449_v37, %v1630_v61 }
 0x23c   : > { %v1660_v63 = vmul.f32 1.442695, %v1652_v62 }
 0x23d   : > { %v1633_v0 = vpop.xlane.xlu0 %1632 }
 0x23e   : > { %2714 = vpow2.f32 %v1660_v63  ;;  %v1653_v2 = vsub.f32 %v1452_v40, %v1633_v0 }
 0x240   : > { %v1662_v3 = vmul.f32 1.442695, %v1653_v2 }
 0x242   : > { %2716 = vpow2.f32 %v1662_v3 }
 0x248   : > { %v1636_v4 = vpop.xlane.xlu1 %1635 }
 0x249   : > { %v1654_v5 = vsub.f32 %v1506_v43, %v1636_v4 }
 0x24b   : > { %v2715_v6 = vpop.eup %2714  ;;  %v1664_v7 = vmul.f32 1.442695, %v1654_v5  ;;  %v1924_v5 = vld [vmem:[%s3181_s8] sm:$0xf] }
 0x24c   : > { %v1676_v8 = vsel %vm1627_vm4, %v2715_v6, 0.0  ;;  %v1639_v9 = vpop.xlane.xlu1 %1638 }
 0x24d   : > { %1677 = vadd.xlane.f32.xlu0 %v1676_v8  ;;  %2718 = vpow2.f32 %v1664_v7  ;;  %v1655_v10 = vsub.f32 %v1509_v46, %v1639_v9  ;;  %v1925_v7 = vld [vmem:[%s3181_s8 + $0x4] sm:$0xf] }
 0x24e   : > { %v1980_v8 = vsel %vm1931_vm5, %v1925_v7, 0 }
 0x24f   : > { %v2717_v11 = vpop.eup %2716  ;;  %v1666_v12 = vmul.f32 1.442695, %v1655_v10 }
 0x250   : > { %v1679_v13 = vsel %vm1627_vm4, %v2717_v11, 0.0 }
 0x251   : > { %v1642_v14 = vpop.xlane.xlu0 %1641  ;;  %1680 = vadd.xlane.f32.xlu1 %v1679_v13  ;;  %2720 = vpow2.f32 %v1666_v12 }
 0x252   : > { %v1656_v15 = vsub.f32 %v1563_v49, %v1642_v14 }
 0x254   : > { %v1668_v16 = vmul.f32 1.442695, %v1656_v15 }
 0x255   : > { %v1645_v17 = vpop.xlane.xlu1 %1644 }
 0x256   : > { %2722 = vpow2.f32 %v1668_v16  ;;  %v1657_v18 = vsub.f32 %v1566_v52, %v1645_v17 }
 0x258   : > { %v1670_v19 = vmul.f32 1.442695, %v1657_v18  ;;  %v1927_v18 = vld [vmem:[%s3181_s8 + $0xc] sm:$0xf] }
 0x25a   : > { %2724 = vpow2.f32 %v1670_v19  ;;  %v2719_v20 = vpop.eup %2718 }
 0x25b   : > { %v1682_v21 = vsel %vm1627_vm4, %v2719_v20, 0.0 }
 0x25c   : > { %1683 = vadd.xlane.f32.xlu0 %v1682_v21  ;;  %v2074_v21 = vsel %vm1931_vm5, %v1927_v18, 0 }
 0x25e   : > { %v2721_v22 = vpop.eup %2720 }
 0x25f   : > { %v1685_v23 = vsel %vm1627_vm4, %v2721_v22, 0.0 }
 0x260   : > { %v1648_v24 = vpop.xlane.xlu0 %1647  ;;  %1686 = vadd.xlane.f32.xlu1 %v1685_v23 }
 0x261   : > { %v1658_v25 = vsub.f32 %v1620_v55, %v1648_v24  ;;  %v2713_v55 = vld [vmem:[#allocation4 + $0x18] sm:$0xff]  }
 0x263   : > { %v2723_v26 = vpop.eup %2722  ;;  %v1672_v27 = vmul.f32 1.442695, %v1658_v25 }
 0x264   : > { %v1688_v28 = vsel %vm1627_vm4, %v2723_v26, 0.0  ;;  %v1651_v29 = vpop.xlane.xlu1 %1650 }
 0x265   : > { %1689 = vadd.xlane.f32.xlu0 %v1688_v28  ;;  %2726 = vpow2.f32 %v1672_v27  ;;  %v1659_v30 = vsub.f32 %v1623_v58, %v1651_v29 }
 0x267   : > { %v2725_v31 = vpop.eup %2724  ;;  %v1674_v32 = vmul.f32 1.442695, %v1659_v30 }
 0x268   : > { %v1691_v33 = vsel %vm1627_vm4, %v2725_v31, 0.0 }
 0x269   : > { %1692 = vadd.xlane.f32.xlu1 %v1691_v33  ;;  %2728 = vpow2.f32 %v1674_v32 }
 0x272   : > { %v2727_v34 = vpop.eup %2726 }
 0x273   : > { %v1694_v35 = vsel %vm1627_vm4, %v2727_v34, 0.0 }
 0x274   : > { %1695 = vadd.xlane.f32.xlu0 %v1694_v35 }
 0x276   : > { %v2729_v36 = vpop.eup %2728 }
 0x277   : > { %v1697_v37 = vsel %vm1627_vm4, %v2729_v36, 0.0 }
 0x278   : > { %1698 = vadd.xlane.f32.xlu1 %v1697_v37 }
 0x2d6   : > { %v1678_v38 = vpop.xlane.xlu0 %1677 }
 0x2d7   : > { %2730 = vrcp.f32 %v1678_v38 }
 0x2da   : > { %v1681_v39 = vpop.xlane.xlu1 %1680 }
 0x2db   : > { %2732 = vrcp.f32 %v1681_v39 }
 0x2e4   : > { %v2731_v40 = vpop.eup %2730 }
 0x2e5   : > { %v1684_v41 = vpop.xlane.xlu0 %1683  ;;  %v1708_v43 = vmul.f32 %v2731_v40, %v2715_v6  ;;  %v1933_v6 = vsel %vm1931_vm5, %v1924_v5, 0  ;;  %v2751_v5 = vld [vmem:[%s2861_s16 + $0x8] sm:$0xff] }
 0x2e6   : > { %2734 = vrcp.f32 %v1684_v41 }
 0x2e8   : > { %v2733_v42 = vpop.eup %2732 }
 0x2e9   : > { %v1709_v44 = vmul.f32 %v2733_v42, %v2717_v11  ;;  %v1687_v45 = vpop.xlane.xlu1 %1686  ;;  %v1926_v11 = vld [vmem:[%s3181_s8 + $0x8] sm:$0xf] }
 0x2ea   : > { %2736 = vrcp.f32 %v1687_v45  ;;  %v2027_v14 = vsel %vm1931_vm5, %v1926_v11, 0 }
 0x2eb   : > { %v1716_v46 = vpack.c.bf16 %v1709_v44, %v1708_v43 }
 0x2ed   : > { %2623 = vmatmul.mubr.msk.bf16.vlgmr.msra.gmra.mxu0 %vm1627_vm4, %v1716_v46 }
 0x2ee   : > { %2633 = vmatpush3.bf16.msra.mxu0 %v2712_v47  ;;  %v1690_v48 = vpop.xlane.xlu0 %1689  ;;  %2634 = vmatprep.mubr.msk.bf16.mxu0 %vm2761_vm0, %v2760_v1 }
 0x2ef   : > { %2644 = vmatprep.subr.bf16.mxu0 %v2760_v1  ;;  %2738 = vrcp.f32 %v1690_v48 }
 0x2f2   : > { %v1693_v49 = vpop.xlane.xlu1 %1692 }
 0x2f3   : > { %2740 = vrcp.f32 %v1693_v49  ;;  %v2735_v50 = vpop.eup %2734 }
 0x2f4   : > { %v1710_v52 = vmul.f32 %v2735_v50, %v2719_v20 }
 0x2f7   : > { %v2737_v51 = vpop.eup %2736 }
 0x2f8   : > { %v1711_v53 = vmul.f32 %v2737_v51, %v2721_v22 }
 0x2fa   : > { %v1717_v54 = vpack.c.bf16 %v1711_v53, %v1710_v52 }
 0x2fc   : > { %2629 = vmatmul.mubr.msk.bf16.vlgmr.msra.gmra.mxu1 %vm1627_vm4, %v1717_v54  ;;  %v2739_v56 = vpop.eup %2738  ;;  %v2408_v54 = vld [vmem:[%s3182_s9] ss:$0 sm:$0xff] }
 0x2fd   : > { %2639 = vmatpush3.bf16.msra.mxu1 %v2713_v55  ;;  %v1696_v57 = vpop.xlane.xlu0 %1695  ;;  %2640 = vmatprep.mubr.msk.bf16.mxu1 %vm2761_vm0, %v2760_v1  ;;  %v1712_v59 = vmul.f32 %v2739_v56, %v2723_v26 }
 0x2fe   : > { %2650 = vmatprep.subr.bf16.mxu1 %v2760_v1  ;;  %2742 = vrcp.f32 %v1696_v57 }
 0x300   : > { %v2741_v58 = vpop.eup %2740 }
 0x301   : > { %v1713_v60 = vmul.f32 %v2741_v58, %v2725_v31  ;;  %v1699_v61 = vpop.xlane.xlu1 %1698 }
 0x302   : > { %2744 = vrcp.f32 %v1699_v61 }
 0x303   : > { %v1718_v62 = vpack.c.bf16 %v1713_v60, %v1712_v59 }
 0x305   : > { %2635 = vmatmul.mubr.msk.bf16.vlgmr.msra.gmra.mxu0 %vm1627_vm4, %v1718_v62 }
 0x306   : > { %2646 = vmatprep.mubr.msk.bf16.mxu0 %vm2761_vm0, %v2760_v1  ;;  %2645 = vmatpush3.bf16.msra.mxu0 %v1933_v6 }
 0x307   : > { %2656 = vmatprep.subr.bf16.mxu0 %v2760_v1 }
 0x30b   : > { %v2743_v63 = vpop.eup %2742 }
 0x30c   : > { %v1714_v2 = vmul.f32 %v2743_v63, %v2727_v34 }
 0x30f   : > { %v2745_v0 = vpop.eup %2744 }
 0x310   : > { %v1715_v3 = vmul.f32 %v2745_v0, %v2729_v36  ;;  %v2750_v0 = vld [vmem:[%s2861_s16] sm:$0xff] }
 0x312   : > { %v1719_v4 = vpack.c.bf16 %v1715_v3, %v1714_v2 }
 0x314   : > { %2641 = vmatmul.mubr.msk.bf16.vlgmr.msra.gmra.mxu1 %vm1627_vm4, %v1719_v4 }
 0x315   : > { %2652 = vmatprep.mubr.msk.bf16.mxu1 %vm2761_vm0, %v2760_v1  ;;  %2651 = vmatpush3.bf16.msra.mxu1 %v1980_v8 }
 0x316   : > { %2662 = vmatprep.subr.bf16.mxu1 %v2760_v1 }
 0x3ad   : > { %v1763_v9 = vpop.f32.mrf.mxu0 }
 0x3af   : > { %v2624_v10 = vpop.f32.mrf.mxu0 }
 0x3b1   : > { %v1766_v12 = vpop.f32.mrf.mxu0 }
 0x3b2   : > { %v1920_v13 = vpack.c.bf16 %v1766_v12, %v1763_v9 }
 0x3b3   : > { %v2625_v15 = vpop.f32.mrf.mxu0 }
 0x3b4   : > { %2647 = vmatmul.mubr.msk.bf16.vlgmr.msra.gmra.mxu0 %vm1408_vm3, %v1920_v13 }
 0x3b5   : > { %2657 = vmatpush3.bf16.msra.mxu0 %v2027_v14  ;;  %2658 = vmatprep.mubr.msk.bf16.mxu0 %vm2761_vm0, %v2760_v1 }
 0x3bc   : > { %v1813_v16 = vpop.f32.mrf.mxu1 }
 0x3be   : > { %v2630_v17 = vpop.f32.mrf.mxu1 }
 0x3c0   : > { %v1816_v19 = vpop.f32.mrf.mxu1 }
 0x3c1   : > { %v1921_v20 = vpack.c.bf16 %v1816_v19, %v1813_v16 }
 0x3c2   : > { %v2631_v22 = vpop.f32.mrf.mxu1 }
 0x3c3   : > { %2653 = vmatmul.mubr.msk.bf16.vlgmr.msra.gmra.mxu1 %vm1408_vm3, %v1921_v20 }
 0x3c4   : > { %2663 = vmatpush3.bf16.msra.mxu1 %v2074_v21  ;;  %2664 = vmatprep.mubr.msk.bf16.mxu1 %vm2761_vm0, %v2760_v1 }
 0x3c5   : > { %v1863_v23 = vpop.f32.mrf.mxu0 }
 0x3c7   : > { %v2636_v24 = vpop.f32.mrf.mxu0 }
 0x3c9   : > { %v1866_v25 = vpop.f32.mrf.mxu0 }
 0x3ca   : > { %v1922_v26 = vpack.c.bf16 %v1866_v25, %v1863_v23  ;;  %v2409_v25 = vld [vmem:[%s3183_s10] ss:$0 sm:$0xff] }
 0x3cb   : > { %v2637_v27 = vpop.f32.mrf.mxu0 }
 0x3cc   : > { %2659 = vmatmul.mubr.msk.bf16.vlgmr.msra.gmra.mxu0 %vm1408_vm3, %v1922_v26  ;;  %v2410_v27 = vld [vmem:[%s3184_s11] ss:$0 sm:$0xff] }
 0x3d4   : > { %v1913_v28 = vpop.f32.mrf.mxu1 }
 0x3d6   : > { %v2642_v29 = vpop.f32.mrf.mxu1 }
 0x3d8   : > { %v1916_v30 = vpop.f32.mrf.mxu1 }
 0x3d9   : > { %v1923_v31 = vpack.c.bf16 %v1916_v30, %v1913_v28 }
 0x3da   : > { %v2643_v32 = vpop.f32.mrf.mxu1 }
 0x3db   : > { %2665 = vmatmul.mubr.msk.bf16.vlgmr.msra.gmra.mxu1 %vm1408_vm3, %v1923_v31 }
 0x474   : > { %v1969_v33 = vpop.f32.mrf.mxu0 }
 0x475   : > { %v2117_v45 = vsel %vm466_vm1, %v1969_v33, 0.0 }
 0x476   : > { %v2648_v34 = vpop.f32.mrf.mxu0 }
 0x478   : > { %v1972_v35 = vpop.f32.mrf.mxu0 }
 0x479   : > { %v2124_v51 = vsel %vm466_vm1, %v1972_v35, 0.0 }
 0x47a   : > { %v2649_v36 = vpop.f32.mrf.mxu0 }
 0x483   : > { %v2016_v37 = vpop.f32.mrf.mxu1 }
 0x484   : > { %v2118_v44 = vsel %vm466_vm1, %v2016_v37, 0.0 }
 0x485   : > { %v2654_v38 = vpop.f32.mrf.mxu1  ;;  %v2119_v47 = vadd.f32 %v2118_v44, %v2117_v45 }
 0x487   : > { %v2019_v1 = vpop.f32.mrf.mxu1 }
 0x488   : > { %v2125_v48 = vsel %vm466_vm1, %v2019_v1, 0.0 }
 0x489   : > { %v2655_v39 = vpop.f32.mrf.mxu1  ;;  %v2126_v55 = vadd.f32 %v2125_v48, %v2124_v51 }
 0x48c   : > { %v2063_v40 = vpop.f32.mrf.mxu0 }
 0x48d   : > { %v2120_v46 = vsel %vm466_vm1, %v2063_v40, 0.0 }
 0x48e   : > { %v2660_v41 = vpop.f32.mrf.mxu0  ;;  %v2121_v49 = vadd.f32 %v2120_v46, %v2119_v47 }
 0x490   : > { %v2066_v42 = vpop.f32.mrf.mxu0 }
 0x491   : > { %v2127_v52 = vsel %vm466_vm1, %v2066_v42, 0.0 }
 0x492   : > { %v2661_v43 = vpop.f32.mrf.mxu0  ;;  %v2128_v58 = vadd.f32 %v2127_v52, %v2126_v55 }
 0x49b   : > { %v2110_v50 = vpop.f32.mrf.mxu1 }
 0x49c   : > { %v2122_v53 = vsel %vm466_vm1, %v2110_v50, 0.0 }
 0x49d   : > { %v2123_v56 = vadd.f32 %v2122_v53, %v2121_v49  ;;  %v2666_v57 = vpop.f32.mrf.mxu1 }
 0x49f   : > { %v2138_v59 = vadd.f32 %v2408_v54, %v2123_v56  ;;  %v2113_v60 = vpop.f32.mrf.mxu1 }
 0x4a0   : > { %v2129_v61 = vsel %vm466_vm1, %v2113_v60, 0.0 }
 0x4a1   : > { %v2130_v62 = vadd.f32 %v2129_v61, %v2128_v58  ;;  %v2667_v63 = vpop.f32.mrf.mxu1  ;;  %v2140_v2 = vadd.f32 %v2750_v0, %v2138_v59 }
 0x4a3   : > { %v2139_v3 = vadd.f32 %v2408_v54, %v2130_v62  ;;  %v2142_v4 = vsel %vm466_vm1, %v2140_v2, 0.0 }
 0x4a4   : > { %2143 = vadd.xlane.f32.xlu0 %v2142_v4 }
 0x4a5   : > { %v2141_v6 = vadd.f32 %v2751_v5, %v2139_v3 }
 0x4a7   : > { %v2145_v7 = vsel %vm466_vm1, %v2141_v6, 0.0 }
 0x4a8   : > { %2146 = vadd.xlane.f32.xlu1 %v2145_v7 }
 0x52d   : > { %v2144_v8 = vpop.xlane.xlu0 %2143 }
 0x52e   : > { %v2149_v9 = vmul.f32 0.03125, %v2144_v8 }
 0x530   : > { %v2151_v10 = vsub.f32 %v2140_v2, %v2149_v9 }
 0x531   : > { %v2147_v11 = vpop.xlane.xlu1 %2146 }
 0x532   : > { %v2150_v12 = vmul.f32 0.03125, %v2147_v11  ;;  %v2153_v13 = vmul.f32 %v2151_v10, %v2151_v10 }
 0x534   : > { %v2152_v14 = vsub.f32 %v2141_v6, %v2150_v12  ;;  %v2155_v15 = vsel %vm466_vm1, %v2153_v13, 0.0 }
 0x535   : > { %2156 = vadd.xlane.f32.xlu0 %v2155_v15 }
 0x536   : > { %v2154_v16 = vmul.f32 %v2152_v14, %v2152_v14 }
 0x538   : > { %v2158_v17 = vsel %vm466_vm1, %v2154_v16, 0.0 }
 0x539   : > { %2159 = vadd.xlane.f32.xlu1 %v2158_v17 }
 0x5be   : > { %v2157_v18 = vpop.xlane.xlu0 %2156 }
 0x5bf   : > { %v2161_v19 = vmul.f32 0.03125, %v2157_v18 }
 0x5c1   : > { %v2163_v20 = vadd.f32 1e-05, %v2161_v19 }
 0x5c2   : > { %v2160_v21 = vpop.xlane.xlu1 %2159 }
 0x5c3   : > { %2746 = vrsqrt.f32 %v2163_v20  ;;  %v2162_v22 = vmul.f32 0.03125, %v2160_v21 }
 0x5c5   : > { %v2164_v23 = vadd.f32 1e-05, %v2162_v22 }
 0x5c7   : > { %2748 = vrsqrt.f32 %v2164_v23 }
 0x5d0   : > { %v2747_v24 = vpop.eup %2746 }
 0x5d1   : > { %v2167_v26 = vmul.f32 %v2747_v24, %v2151_v10 }
 0x5d3   : > { %v2176_v28 = vmul.f32 %v2409_v25, %v2167_v26 }
 0x5d4   : > { %v2749_v29 = vpop.eup %2748 }
 0x5d5   : > { %v2185_v30 = vadd.f32 %v2410_v27, %v2176_v28  ;;  %v2168_v31 = vmul.f32 %v2749_v29, %v2152_v14 }
 0x5d7   : > { %2187 = vst.msk [vmem:[%s433_s25] sm:$0xff] %vm466_vm1, %v2185_v30  ;;  %v2177_v32 = vmul.f32 %v2409_v25, %v2168_v31 }
 0x5d9   : > { %v2186_v33 = vadd.f32 %v2410_v27, %v2177_v32 }
 0x5db   : > { %2188 = vst.msk [vmem:[%s433_s25 + $0x8] sm:$0xff] %vm466_vm1, %v2186_v33 }
 0x5dc PF: > { %s22_s21 = sadd.s32 1, %s2758_s21  }
 0x5dd   : > { %p19_p4 = scmp.ge.s32.totalorder %s22_s21, 4  }
 0x5df   :  { %21 = sbr.rel (!%p19_p4) target bundleno = 1 (0x1), region = 128 }

</bundles_post_ra>
